<compile_context>
chip_gen: v6e
topology: v6e:2x2x1
jax: 0.10.0
libtpu: 0.0.40
codegen_flags: <defaults>
</compile_context>

<pallas_src>
import functools
import numpy as np
import jax
import jax.numpy as jnp
from jax import lax
from jax.experimental import pallas as pl
from jax.experimental.pallas import tpu as pltpu

EPS_BN = 1e-5


def resnet_block_kernel(xl_ref, w1cs_ref, w1h_ref, w2b_ref, gb_ref, out_ref,
                        *, H, Cout):
    # xl_ref   : (N*H, W*Cin)       lane-dense input
    # w1cs_ref : (W*Cin, 2*W*Cout)  [conv1 center tap | block-diag 1x1 shortcut]
    # w1h_ref  : (2*W*Cin, W*Cout)  [conv1 up tap ; conv1 down tap]
    # w2b_ref  : (3*W*Cout, W*Cout) banded conv2 weights (up / mid / down blocks)
    # gb_ref   : (6, Cout)          rows: [g1; b1; g2; b2; gs; bs]
    # out_ref  : (N*H, W*Cout)      lane-dense output
    NH, WCi = xl_ref.shape
    WCo = out_ref.shape[1]
    Wdim = WCo // Cout
    inv_m = 1.0 / (NH * Wdim)          # 1 / (N*H*W) elements per channel

    # ---- structural 0/1 matrices built in-kernel (VPU iota; no DMA) ----
    gr = lax.broadcasted_iota(jnp.int32, (WCo, Cout), 0)
    gc = lax.broadcasted_iota(jnp.int32, (WCo, Cout), 1)
    G = ((gr % Cout) == gc).astype(jnp.float32)        # (WCo, Cout) channel gather
    tr = lax.broadcasted_iota(jnp.int32, (Cout, WCo), 0)
    tc = lax.broadcasted_iota(jnp.int32, (Cout, WCo), 1)
    GT = ((tc % Cout) == tr).astype(jnp.float32)       # (Cout, WCo) channel scatter

    def halo(h):
        # Rows h-1 / h+1 of every image: XLU sublane rolls + iota boundary masks
        # (replaces the previous masked shift-matmuls on the MXU critical path).
        n, c = h.shape
        r = lax.broadcasted_iota(jnp.int32, (n, c), 0)
        up = jnp.where((r % H) != 0, pltpu.roll(h, 1, axis=0), 0.0)
        dn = jnp.where((r % H) != H - 1, pltpu.roll(h, n - 1, axis=0), 0.0)
        return up, dn

    def fused_bn(hs, gammas, betas):
        # One-pass training-mode BatchNorm for several (NH, WCo) pre-activations
        # sharing a single stats matmul and a single widening matmul.
        k = len(hs)
        stacked = jnp.concatenate([t for h in hs for t in (h, h * h)], axis=0)
        stat = jnp.dot(stacked, G, preferred_element_type=jnp.float32)  # (2k*NH, Cout)
        coeffs = []
        for i in range(k):
            s1 = jnp.sum(stat[2 * i * NH:(2 * i + 1) * NH], axis=0, keepdims=True)
            s2 = jnp.sum(stat[(2 * i + 1) * NH:(2 * i + 2) * NH], axis=0,
                         keepdims=True)
            mean = s1 * inv_m
            var = s2 * inv_m - mean * mean          # biased variance (BN training)
            scale = gammas[i] * lax.rsqrt(var + EPS_BN)        # EUP rsqrt
            shift = betas[i] - mean * scale
            coeffs.append((scale, shift))
        packed = jnp.concatenate([c for pair in coeffs for c in pair], axis=0)
        wide = jnp.dot(packed, GT, preferred_element_type=jnp.float32)  # (2k, WCo)
        return [(wide[2 * i:2 * i + 1], wide[2 * i + 1:2 * i + 2]) for i in range(k)]

    x = xl_ref[...]                                    # (NH, WCi)
    xu, xd = halo(x)

    # ---- conv1 center tap + 1x1 shortcut in ONE MXU push; halo taps accumulate ----
    c1 = jnp.dot(x, w1cs_ref[...], preferred_element_type=jnp.float32)  # (NH, 2*WCo)
    h1 = (c1[:, :WCo]
          + jnp.dot(xu, w1h_ref[0:WCi, :], preferred_element_type=jnp.float32)
          + jnp.dot(xd, w1h_ref[WCi:2 * WCi, :], preferred_element_type=jnp.float32))
    sc = c1[:, WCo:]                                   # shortcut pre-BN

    # ---- BN stats for conv1 output and shortcut gathered together ----
    (s1c, s1h), (ssc, ssh) = fused_bn(
        [h1, sc],
        [gb_ref[0:1, :], gb_ref[4:5, :]],
        [gb_ref[1:2, :], gb_ref[5:6, :]])
    a1 = jnp.maximum(h1 * s1c + s1h, 0.0)              # BN1 + ReLU

    # ---- conv2: three banded partial products accumulated (no lane concat) ----
    au, ad = halo(a1)
    h2 = (jnp.dot(au, w2b_ref[0:WCo, :], preferred_element_type=jnp.float32)
          + jnp.dot(a1, w2b_ref[WCo:2 * WCo, :], preferred_element_type=jnp.float32)
          + jnp.dot(ad, w2b_ref[2 * WCo:3 * WCo, :], preferred_element_type=jnp.float32))

    (s2c, s2h), = fused_bn([h2], [gb_ref[2:3, :]], [gb_ref[3:4, :]])

    # ---- BN2 + shortcut BN + residual add + final ReLU; unmasked 128-lane store ----
    out_ref[...] = jnp.maximum(h2 * s2c + sc * ssc + (s2h + ssh), 0.0)


def band_toeplitz_np(wk, W):
    """(3,3,Ci,Co) HWIO conv kernel -> (3*W*Ci, W*Co) banded matmul matrix (numpy).

    Row index = (kh*W + wv)*Ci + ci, col index = w*Co + co; entry equals
    wk[kh, wv-w+1, ci, co] when |wv-w| <= 1 else 0 (W boundary baked in).
    """
    KH, KW, Ci, Co = wk.shape
    sel = np.zeros((KW, W, W), np.float32)
    for kw in range(KW):
        for w in range(W):
            wv = w + kw - (KW // 2)
            if 0 <= wv < W:
                sel[kw, wv, w] = 1.0
    big = np.einsum('kvw,hkio->hviwo', sel, wk)
    return np.ascontiguousarray(big.reshape(KH * W * Ci, W * Co)).astype(np.float32)


def prepare_params(params, W):
    """One-time host-side (numpy) construction of all kernel operands."""
    w1 = np.asarray(params["w1"], np.float32)           # (3,3,Cin,Cout) HWIO
    w2 = np.asarray(params["w2"], np.float32)           # (3,3,Cout,Cout)
    ws = np.asarray(params["ws"], np.float32)           # (Cin, Cout)
    Cin, Cout = ws.shape
    WCi = W * Cin

    w1b = band_toeplitz_np(w1, W)                        # (3*W*Cin , W*Cout)
    w2b = band_toeplitz_np(w2, W)                        # (3*W*Cout, W*Cout)
    wsb = np.kron(np.eye(W, dtype=np.float32), ws)       # (W*Cin   , W*Cout)

    w1cs = np.concatenate([w1b[WCi:2 * WCi], wsb], axis=1)          # (WCi, 2*WCo)
    w1h = np.concatenate([w1b[0:WCi], w1b[2 * WCi:3 * WCi]], axis=0)  # (2*WCi, WCo)

    gb = np.concatenate([np.asarray(params[k], np.float32)
                         for k in ("g1", "b1", "g2", "b2", "gs", "bs")], axis=0)

    # TODO(synk): weights could be cast to bf16 (fewer MXU passes) once the
    # downstream tolerance is loosened; kept f32 to preserve the 2e-3 check.
    return {"w1cs": jnp.asarray(w1cs), "w1h": jnp.asarray(w1h),
            "w2b": jnp.asarray(w2b), "gb": jnp.asarray(gb)}


@jax.jit
def _forward_impl(x_nchw, w1cs, w1h, w2b, gb):
    N, Cin, H, W = x_nchw.shape
    Cout = gb.shape[1]
    NH, WCi, WCo = N * H, W * Cin, W * Cout

    # NCHW -> lane-dense (N*H, W*Cin).  TODO(synk): when stacking several
    # ResNet blocks, keep activations in this layout between blocks to drop the
    # per-block transposes from the critical path.
    x_flat = jnp.transpose(x_nchw, (0, 2, 3, 1)).reshape(NH, WCi)

    # Single invocation: whole working set is a few hundred KiB of VMEM.
    # TODO(synk): if N/H/W scale up, add a row-tiled grid with
    # dimension_semantics=("parallel",) for v7x's 2 TensorCores, a two-phase
    # BatchNorm (partial sums then combine), and vmem_limit_bytes sized for
    # v7x's 64 MiB VMEM.
    kernel = functools.partial(resnet_block_kernel, H=H, Cout=Cout)
    out_flat = pl.pallas_call(
        kernel,
        out_shape=jax.ShapeDtypeStruct((NH, WCo), jnp.float32),
        in_specs=[pl.BlockSpec(memory_space=pltpu.MemorySpace.VMEM)] * 5,
        out_specs=pl.BlockSpec(memory_space=pltpu.MemorySpace.VMEM),
    )(x_flat, w1cs, w1h, w2b, gb)

    return jnp.transpose(out_flat.reshape(N, H, W, Cout), (0, 3, 1, 2))


def resnet_block_forward(x_nchw, prepped):
    return _forward_impl(x_nchw, prepped["w1cs"], prepped["w1h"],
                         prepped["w2b"], prepped["gb"])


def ref_forward(x_nchw, params):
    """Pure-JAX reference (same math) for a sanity check."""
    x = jnp.transpose(x_nchw, (0, 2, 3, 1))
    Cin, Cout = params["ws"].shape

    def conv(h, w, pad):
        return jax.lax.conv_general_dilated(
            h, w, (1, 1), [(pad, pad), (pad, pad)],
            dimension_numbers=("NHWC", "HWIO", "NHWC"))

    def bn(h, g, b):
        m = jnp.mean(h, axis=(0, 1, 2), keepdims=True)
        v = jnp.mean((h - m) ** 2, axis=(0, 1, 2), keepdims=True)
        return (h - m) * jax.lax.rsqrt(v + EPS_BN) * g.reshape(1, 1, 1, -1) \
            + b.reshape(1, 1, 1, -1)

    a1 = jax.nn.relu(bn(conv(x, params["w1"], 1), params["g1"], params["b1"]))
    h2 = bn(conv(a1, params["w2"], 1), params["g2"], params["b2"])
    sc = bn(conv(x, params["ws"].reshape(1, 1, Cin, Cout), 0),
            params["gs"], params["bs"])
    return jnp.transpose(jax.nn.relu(h2 + sc), (0, 3, 1, 2))


if __name__ == "__main__":
    N, Cin, Cout, H, W = 2, 4, 8, 16, 16

    key = jax.random.PRNGKey(0)
    k_x, k_w1, k_w2, k_ws = jax.random.split(key, 4)

    x = jax.random.normal(k_x, (N, Cin, H, W), jnp.float32)

    params = {
        # conv weights in HWIO layout (PyTorch OIHW shapes transposed)
        "w1": 0.1 * jax.random.normal(k_w1, (3, 3, Cin, Cout), jnp.float32),
        "w2": 0.1 * jax.random.normal(k_w2, (3, 3, Cout, Cout), jnp.float32),
        "ws": 0.1 * jax.random.normal(k_ws, (Cin, Cout), jnp.float32),
        # BatchNorm2d default init: gamma=1, beta=0
        "g1": jnp.ones((1, Cout), jnp.float32),
        "b1": jnp.zeros((1, Cout), jnp.float32),
        "g2": jnp.ones((1, Cout), jnp.float32),
        "b2": jnp.zeros((1, Cout), jnp.float32),
        "gs": jnp.ones((1, Cout), jnp.float32),
        "bs": jnp.zeros((1, Cout), jnp.float32),
    }
    # TODO(synk): dropout>0 (train-mode RNG masking) and BN running-stat updates
    # are not exercised; this config uses dropout=0.0 / forward-pass batch stats.

    prepped = prepare_params(params, W)                 # one-time constant prep

    out = jax.block_until_ready(resnet_block_forward(x, prepped))
    ref = jax.block_until_ready(ref_forward(x, params))

    assert out.shape == (N, Cout, H, W)
    assert jnp.allclose(out, ref, atol=2e-3, rtol=2e-3), \
        f"max abs diff {jnp.max(jnp.abs(out - ref))}"

    print("KERNEL_OK")
</pallas_src>

<mosaic_0001>
module attributes {stable_mosaic.version = 11 : i64} {
  func.func @resnet_block_kernel(%arg0: memref<32x64xf32, #tpu.memory_space<vmem>>, %arg1: memref<64x256xf32, #tpu.memory_space<vmem>>, %arg2: memref<128x128xf32, #tpu.memory_space<vmem>>, %arg3: memref<384x128xf32, #tpu.memory_space<vmem>>, %arg4: memref<6x8xf32, #tpu.memory_space<vmem>>, %arg5: memref<32x128xf32, #tpu.memory_space<vmem>>) attributes {dimension_semantics = [], scalar_prefetch = 0 : i64, scratch_operands = 0 : i64, tpu.core_type = #tpu.core_type<tc>} {
    %0 = tpu.iota {dimensions = array<i32: 0>} : vector<128x8xi32>
    %1 = tpu.iota {dimensions = array<i32: 1>} : vector<128x8xi32>
    %c8_i32 = arith.constant 8 : i32
    %c0_i32 = arith.constant 0 : i32
    %2 = arith.cmpi eq, %c8_i32, %c0_i32 : i32
    %c1_i32 = arith.constant 1 : i32
    %3 = arith.select %2, %c1_i32, %c8_i32 : i32
    %4 = vector.broadcast %3 : i32 to vector<128x8xi32>
    %5 = arith.remsi %0, %4 : vector<128x8xi32>
    %c0_i32_0 = arith.constant 0 : i32
    %6 = vector.broadcast %c0_i32_0 : i32 to vector<128x8xi32>
    %7 = arith.cmpi ne, %5, %6 : vector<128x8xi32>
    %c0_i32_1 = arith.constant 0 : i32
    %8 = vector.broadcast %c0_i32_1 : i32 to vector<128x8xi32>
    %9 = arith.cmpi slt, %5, %8 : vector<128x8xi32>
    %c0_i32_2 = arith.constant 0 : i32
    %10 = arith.cmpi slt, %3, %c0_i32_2 : i32
    %11 = vector.broadcast %10 : i1 to vector<128x8xi1>
    %12 = vector.broadcast %11 : vector<128x8xi1> to vector<128x8xi1>
    %13 = arith.xori %9, %12 : vector<128x8xi1>
    %14 = arith.andi %13, %7 : vector<128x8xi1>
    %15 = vector.broadcast %3 : i32 to vector<128x8xi32>
    %16 = arith.addi %5, %15 : vector<128x8xi32>
    %17 = arith.select %14, %16, %5 : vector<128x8xi1>, vector<128x8xi32>
    %18 = arith.cmpi eq, %17, %1 : vector<128x8xi32>
    %19 = arith.extui %18 : vector<128x8xi1> to vector<128x8xi32>
    %20 = arith.sitofp %19 : vector<128x8xi32> to vector<128x8xf32>
    %21 = tpu.iota {dimensions = array<i32: 0>} : vector<8x128xi32>
    %22 = tpu.iota {dimensions = array<i32: 1>} : vector<8x128xi32>
    %c8_i32_3 = arith.constant 8 : i32
    %c0_i32_4 = arith.constant 0 : i32
    %23 = arith.cmpi eq, %c8_i32_3, %c0_i32_4 : i32
    %c1_i32_5 = arith.constant 1 : i32
    %24 = arith.select %23, %c1_i32_5, %c8_i32_3 : i32
    %25 = vector.broadcast %24 : i32 to vector<8x128xi32>
    %26 = arith.remsi %22, %25 : vector<8x128xi32>
    %c0_i32_6 = arith.constant 0 : i32
    %27 = vector.broadcast %c0_i32_6 : i32 to vector<8x128xi32>
    %28 = arith.cmpi ne, %26, %27 : vector<8x128xi32>
    %c0_i32_7 = arith.constant 0 : i32
    %29 = vector.broadcast %c0_i32_7 : i32 to vector<8x128xi32>
    %30 = arith.cmpi slt, %26, %29 : vector<8x128xi32>
    %c0_i32_8 = arith.constant 0 : i32
    %31 = arith.cmpi slt, %24, %c0_i32_8 : i32
    %32 = vector.broadcast %31 : i1 to vector<8x128xi1>
    %33 = vector.broadcast %32 : vector<8x128xi1> to vector<8x128xi1>
    %34 = arith.xori %30, %33 : vector<8x128xi1>
    %35 = arith.andi %34, %28 : vector<8x128xi1>
    %36 = vector.broadcast %24 : i32 to vector<8x128xi32>
    %37 = arith.addi %26, %36 : vector<8x128xi32>
    %38 = arith.select %35, %37, %26 : vector<8x128xi1>, vector<8x128xi32>
    %39 = arith.cmpi eq, %38, %21 : vector<8x128xi32>
    %40 = arith.extui %39 : vector<8x128xi1> to vector<8x128xi32>
    %41 = arith.sitofp %40 : vector<8x128xi32> to vector<8x128xf32>
    %c0 = arith.constant 0 : index
    %c0_9 = arith.constant 0 : index
    %42 = vector.load %arg0[%c0, %c0_9] : memref<32x64xf32, #tpu.memory_space<vmem>>, vector<32x64xf32>
    %43 = tpu.iota {dimensions = array<i32: 0>} : vector<32x64xi32>
    %c16_i32 = arith.constant 16 : i32
    %c0_i32_10 = arith.constant 0 : i32
    %44 = arith.cmpi eq, %c16_i32, %c0_i32_10 : i32
    %c1_i32_11 = arith.constant 1 : i32
    %45 = arith.select %44, %c1_i32_11, %c16_i32 : i32
    %46 = vector.broadcast %45 : i32 to vector<32x64xi32>
    %47 = arith.remsi %43, %46 : vector<32x64xi32>
    %c0_i32_12 = arith.constant 0 : i32
    %48 = vector.broadcast %c0_i32_12 : i32 to vector<32x64xi32>
    %49 = arith.cmpi ne, %47, %48 : vector<32x64xi32>
    %c0_i32_13 = arith.constant 0 : i32
    %50 = vector.broadcast %c0_i32_13 : i32 to vector<32x64xi32>
    %51 = arith.cmpi slt, %47, %50 : vector<32x64xi32>
    %c0_i32_14 = arith.constant 0 : i32
    %52 = arith.cmpi slt, %45, %c0_i32_14 : i32
    %53 = vector.broadcast %52 : i1 to vector<32x64xi1>
    %54 = vector.broadcast %53 : vector<32x64xi1> to vector<32x64xi1>
    %55 = arith.xori %51, %54 : vector<32x64xi1>
    %56 = arith.andi %55, %49 : vector<32x64xi1>
    %57 = vector.broadcast %45 : i32 to vector<32x64xi32>
    %58 = arith.addi %47, %57 : vector<32x64xi32>
    %59 = arith.select %56, %58, %47 : vector<32x64xi1>, vector<32x64xi32>
    %c0_i32_15 = arith.constant 0 : i32
    %60 = vector.broadcast %c0_i32_15 : i32 to vector<32x64xi32>
    %61 = arith.cmpi ne, %59, %60 : vector<32x64xi32>
    %c1_i32_16 = arith.constant 1 : i32
    %62 = tpu.dynamic_rotate %42 by %c1_i32_16 dim 0 : vector<32x64xf32>, i32 -> vector<32x64xf32>
    %cst = arith.constant 0.000000e+00 : f32
    %63 = vector.broadcast %cst : f32 to vector<32x64xf32>
    %64 = arith.select %61, %62, %63 : vector<32x64xi1>, vector<32x64xf32>
    %c16_i32_17 = arith.constant 16 : i32
    %c0_i32_18 = arith.constant 0 : i32
    %65 = arith.cmpi eq, %c16_i32_17, %c0_i32_18 : i32
    %c1_i32_19 = arith.constant 1 : i32
    %66 = arith.select %65, %c1_i32_19, %c16_i32_17 : i32
    %67 = vector.broadcast %66 : i32 to vector<32x64xi32>
    %68 = arith.remsi %43, %67 : vector<32x64xi32>
    %c0_i32_20 = arith.constant 0 : i32
    %69 = vector.broadcast %c0_i32_20 : i32 to vector<32x64xi32>
    %70 = arith.cmpi ne, %68, %69 : vector<32x64xi32>
    %c0_i32_21 = arith.constant 0 : i32
    %71 = vector.broadcast %c0_i32_21 : i32 to vector<32x64xi32>
    %72 = arith.cmpi slt, %68, %71 : vector<32x64xi32>
    %c0_i32_22 = arith.constant 0 : i32
    %73 = arith.cmpi slt, %66, %c0_i32_22 : i32
    %74 = vector.broadcast %73 : i1 to vector<32x64xi1>
    %75 = vector.broadcast %74 : vector<32x64xi1> to vector<32x64xi1>
    %76 = arith.xori %72, %75 : vector<32x64xi1>
    %77 = arith.andi %76, %70 : vector<32x64xi1>
    %78 = vector.broadcast %66 : i32 to vector<32x64xi32>
    %79 = arith.addi %68, %78 : vector<32x64xi32>
    %80 = arith.select %77, %79, %68 : vector<32x64xi1>, vector<32x64xi32>
    %c15_i32 = arith.constant 15 : i32
    %81 = vector.broadcast %c15_i32 : i32 to vector<32x64xi32>
    %82 = arith.cmpi ne, %80, %81 : vector<32x64xi32>
    %c31_i32 = arith.constant 31 : i32
    %83 = tpu.dynamic_rotate %42 by %c31_i32 dim 0 : vector<32x64xf32>, i32 -> vector<32x64xf32>
    %cst_23 = arith.constant 0.000000e+00 : f32
    %84 = vector.broadcast %cst_23 : f32 to vector<32x64xf32>
    %85 = arith.select %82, %83, %84 : vector<32x64xi1>, vector<32x64xf32>
    %c0_24 = arith.constant 0 : index
    %c0_25 = arith.constant 0 : index
    %86 = vector.load %arg1[%c0_24, %c0_25] : memref<64x256xf32, #tpu.memory_space<vmem>>, vector<64x256xf32>
    %cst_26 = arith.constant dense<0.000000e+00> : vector<32x256xf32>
    %87 = tpu.matmul %42, %86, %cst_26 {dimension_numbers = #tpu.dot_dimension_numbers<[1], [0], [0], [1], [0, 0, 1, 1], [], []>} : vector<32x64xf32>, vector<64x256xf32>, vector<32x256xf32> -> vector<32x256xf32>
    %88 = vector.extract_strided_slice %87 {offsets = [0, 0], sizes = [32, 128], strides = [1, 1]} : vector<32x256xf32> to vector<32x128xf32>
    %c0_27 = arith.constant 0 : index
    %c0_28 = arith.constant 0 : index
    %89 = vector.load %arg2[%c0_27, %c0_28] : memref<128x128xf32, #tpu.memory_space<vmem>>, vector<64x128xf32>
    %cst_29 = arith.constant dense<0.000000e+00> : vector<32x128xf32>
    %90 = tpu.matmul %64, %89, %cst_29 {dimension_numbers = #tpu.dot_dimension_numbers<[1], [0], [0], [1], [0, 0, 1, 1], [], []>} : vector<32x64xf32>, vector<64x128xf32>, vector<32x128xf32> -> vector<32x128xf32>
    %91 = arith.addf %88, %90 : vector<32x128xf32>
    %c64 = arith.constant 64 : index
    %c0_30 = arith.constant 0 : index
    %92 = vector.load %arg2[%c64, %c0_30] : memref<128x128xf32, #tpu.memory_space<vmem>>, vector<64x128xf32>
    %cst_31 = arith.constant dense<0.000000e+00> : vector<32x128xf32>
    %93 = tpu.matmul %85, %92, %cst_31 {dimension_numbers = #tpu.dot_dimension_numbers<[1], [0], [0], [1], [0, 0, 1, 1], [], []>} : vector<32x64xf32>, vector<64x128xf32>, vector<32x128xf32> -> vector<32x128xf32>
    %94 = arith.addf %91, %93 : vector<32x128xf32>
    %95 = vector.extract_strided_slice %87 {offsets = [0, 128], sizes = [32, 128], strides = [1, 1]} : vector<32x256xf32> to vector<32x128xf32>
    %c0_32 = arith.constant 0 : index
    %c0_33 = arith.constant 0 : index
    %96 = vector.load %arg4[%c0_32, %c0_33] : memref<6x8xf32, #tpu.memory_space<vmem>>, vector<1x8xf32>
    %c4 = arith.constant 4 : index
    %c0_34 = arith.constant 0 : index
    %97 = vector.load %arg4[%c4, %c0_34] : memref<6x8xf32, #tpu.memory_space<vmem>>, vector<1x8xf32>
    %c1 = arith.constant 1 : index
    %c0_35 = arith.constant 0 : index
    %98 = vector.load %arg4[%c1, %c0_35] : memref<6x8xf32, #tpu.memory_space<vmem>>, vector<1x8xf32>
    %c5 = arith.constant 5 : index
    %c0_36 = arith.constant 0 : index
    %99 = vector.load %arg4[%c5, %c0_36] : memref<6x8xf32, #tpu.memory_space<vmem>>, vector<1x8xf32>
    %100 = arith.mulf %94, %94 : vector<32x128xf32>
    %101 = arith.mulf %95, %95 : vector<32x128xf32>
    %102 = tpu.concatenate %94, %100, %95, %101 in 0 : vector<32x128xf32>, vector<32x128xf32>, vector<32x128xf32>, vector<32x128xf32> -> vector<128x128xf32>
    %cst_37 = arith.constant dense<0.000000e+00> : vector<128x8xf32>
    %103 = tpu.matmul %102, %20, %cst_37 {dimension_numbers = #tpu.dot_dimension_numbers<[1], [0], [0], [1], [0, 0, 1, 1], [], []>} : vector<128x128xf32>, vector<128x8xf32>, vector<128x8xf32> -> vector<128x8xf32>
    %104 = vector.extract_strided_slice %103 {offsets = [0, 0], sizes = [32, 8], strides = [1, 1]} : vector<128x8xf32> to vector<32x8xf32>
    %cst_38 = arith.constant dense<0.000000e+00> : vector<8xf32>
    %105 = vector.multi_reduction <add>, %104, %cst_38 [0] : vector<32x8xf32> to vector<8xf32>
    %106 = vector.shape_cast %105 : vector<8xf32> to vector<1x8xf32>
    %107 = vector.extract_strided_slice %103 {offsets = [32, 0], sizes = [32, 8], strides = [1, 1]} : vector<128x8xf32> to vector<32x8xf32>
    %cst_39 = arith.constant dense<0.000000e+00> : vector<8xf32>
    %108 = vector.multi_reduction <add>, %107, %cst_39 [0] : vector<32x8xf32> to vector<8xf32>
    %109 = vector.shape_cast %108 : vector<8xf32> to vector<1x8xf32>
    %cst_40 = arith.constant 0.001953125 : f32
    %110 = vector.broadcast %cst_40 : f32 to vector<1x8xf32>
    %111 = arith.mulf %106, %110 : vector<1x8xf32>
    %cst_41 = arith.constant 0.001953125 : f32
    %112 = vector.broadcast %cst_41 : f32 to vector<1x8xf32>
    %113 = arith.mulf %109, %112 : vector<1x8xf32>
    %114 = arith.mulf %111, %111 : vector<1x8xf32>
    %115 = arith.subf %113, %114 : vector<1x8xf32>
    %cst_42 = arith.constant 9.99999974E-6 : f32
    %116 = vector.broadcast %cst_42 : f32 to vector<1x8xf32>
    %117 = arith.addf %115, %116 : vector<1x8xf32>
    %118 = math.rsqrt %117 : vector<1x8xf32>
    %119 = arith.mulf %96, %118 : vector<1x8xf32>
    %120 = arith.mulf %111, %119 : vector<1x8xf32>
    %121 = arith.subf %98, %120 : vector<1x8xf32>
    %122 = vector.extract_strided_slice %103 {offsets = [64, 0], sizes = [32, 8], strides = [1, 1]} : vector<128x8xf32> to vector<32x8xf32>
    %cst_43 = arith.constant dense<0.000000e+00> : vector<8xf32>
    %123 = vector.multi_reduction <add>, %122, %cst_43 [0] : vector<32x8xf32> to vector<8xf32>
    %124 = vector.shape_cast %123 : vector<8xf32> to vector<1x8xf32>
    %125 = vector.extract_strided_slice %103 {offsets = [96, 0], sizes = [32, 8], strides = [1, 1]} : vector<128x8xf32> to vector<32x8xf32>
    %cst_44 = arith.constant dense<0.000000e+00> : vector<8xf32>
    %126 = vector.multi_reduction <add>, %125, %cst_44 [0] : vector<32x8xf32> to vector<8xf32>
    %127 = vector.shape_cast %126 : vector<8xf32> to vector<1x8xf32>
    %cst_45 = arith.constant 0.001953125 : f32
    %128 = vector.broadcast %cst_45 : f32 to vector<1x8xf32>
    %129 = arith.mulf %124, %128 : vector<1x8xf32>
    %cst_46 = arith.constant 0.001953125 : f32
    %130 = vector.broadcast %cst_46 : f32 to vector<1x8xf32>
    %131 = arith.mulf %127, %130 : vector<1x8xf32>
    %132 = arith.mulf %129, %129 : vector<1x8xf32>
    %133 = arith.subf %131, %132 : vector<1x8xf32>
    %cst_47 = arith.constant 9.99999974E-6 : f32
    %134 = vector.broadcast %cst_47 : f32 to vector<1x8xf32>
    %135 = arith.addf %133, %134 : vector<1x8xf32>
    %136 = math.rsqrt %135 : vector<1x8xf32>
    %137 = arith.mulf %97, %136 : vector<1x8xf32>
    %138 = arith.mulf %129, %137 : vector<1x8xf32>
    %139 = arith.subf %99, %138 : vector<1x8xf32>
    %140 = tpu.concatenate %119, %121, %137, %139 in 0 : vector<1x8xf32>, vector<1x8xf32>, vector<1x8xf32>, vector<1x8xf32> -> vector<4x8xf32>
    %cst_48 = arith.constant dense<0.000000e+00> : vector<4x128xf32>
    %141 = tpu.matmul %140, %41, %cst_48 {dimension_numbers = #tpu.dot_dimension_numbers<[1], [0], [0], [1], [0, 0, 1, 1], [], []>} : vector<4x8xf32>, vector<8x128xf32>, vector<4x128xf32> -> vector<4x128xf32>
    %142 = vector.extract_strided_slice %141 {offsets = [0, 0], sizes = [1, 128], strides = [1, 1]} : vector<4x128xf32> to vector<1x128xf32>
    %143 = vector.extract_strided_slice %141 {offsets = [1, 0], sizes = [1, 128], strides = [1, 1]} : vector<4x128xf32> to vector<1x128xf32>
    %144 = vector.extract_strided_slice %141 {offsets = [2, 0], sizes = [1, 128], strides = [1, 1]} : vector<4x128xf32> to vector<1x128xf32>
    %145 = vector.extract_strided_slice %141 {offsets = [3, 0], sizes = [1, 128], strides = [1, 1]} : vector<4x128xf32> to vector<1x128xf32>
    %146 = vector.broadcast %142 : vector<1x128xf32> to vector<32x128xf32>
    %147 = arith.mulf %94, %146 : vector<32x128xf32>
    %148 = vector.broadcast %143 : vector<1x128xf32> to vector<32x128xf32>
    %149 = arith.addf %147, %148 : vector<32x128xf32>
    %cst_49 = arith.constant 0.000000e+00 : f32
    %150 = vector.broadcast %cst_49 : f32 to vector<32x128xf32>
    %151 = arith.maximumf %149, %150 : vector<32x128xf32>
    %152 = tpu.iota {dimensions = array<i32: 0>} : vector<32x128xi32>
    %c16_i32_50 = arith.constant 16 : i32
    %c0_i32_51 = arith.constant 0 : i32
    %153 = arith.cmpi eq, %c16_i32_50, %c0_i32_51 : i32
    %c1_i32_52 = arith.constant 1 : i32
    %154 = arith.select %153, %c1_i32_52, %c16_i32_50 : i32
    %155 = vector.broadcast %154 : i32 to vector<32x128xi32>
    %156 = arith.remsi %152, %155 : vector<32x128xi32>
    %c0_i32_53 = arith.constant 0 : i32
    %157 = vector.broadcast %c0_i32_53 : i32 to vector<32x128xi32>
    %158 = arith.cmpi ne, %156, %157 : vector<32x128xi32>
    %c0_i32_54 = arith.constant 0 : i32
    %159 = vector.broadcast %c0_i32_54 : i32 to vector<32x128xi32>
    %160 = arith.cmpi slt, %156, %159 : vector<32x128xi32>
    %c0_i32_55 = arith.constant 0 : i32
    %161 = arith.cmpi slt, %154, %c0_i32_55 : i32
    %162 = vector.broadcast %161 : i1 to vector<32x128xi1>
    %163 = vector.broadcast %162 : vector<32x128xi1> to vector<32x128xi1>
    %164 = arith.xori %160, %163 : vector<32x128xi1>
    %165 = arith.andi %164, %158 : vector<32x128xi1>
    %166 = vector.broadcast %154 : i32 to vector<32x128xi32>
    %167 = arith.addi %156, %166 : vector<32x128xi32>
    %168 = arith.select %165, %167, %156 : vector<32x128xi1>, vector<32x128xi32>
    %c0_i32_56 = arith.constant 0 : i32
    %169 = vector.broadcast %c0_i32_56 : i32 to vector<32x128xi32>
    %170 = arith.cmpi ne, %168, %169 : vector<32x128xi32>
    %c1_i32_57 = arith.constant 1 : i32
    %171 = tpu.dynamic_rotate %151 by %c1_i32_57 dim 0 : vector<32x128xf32>, i32 -> vector<32x128xf32>
    %cst_58 = arith.constant 0.000000e+00 : f32
    %172 = vector.broadcast %cst_58 : f32 to vector<32x128xf32>
    %173 = arith.select %170, %171, %172 : vector<32x128xi1>, vector<32x128xf32>
    %c16_i32_59 = arith.constant 16 : i32
    %c0_i32_60 = arith.constant 0 : i32
    %174 = arith.cmpi eq, %c16_i32_59, %c0_i32_60 : i32
    %c1_i32_61 = arith.constant 1 : i32
    %175 = arith.select %174, %c1_i32_61, %c16_i32_59 : i32
    %176 = vector.broadcast %175 : i32 to vector<32x128xi32>
    %177 = arith.remsi %152, %176 : vector<32x128xi32>
    %c0_i32_62 = arith.constant 0 : i32
    %178 = vector.broadcast %c0_i32_62 : i32 to vector<32x128xi32>
    %179 = arith.cmpi ne, %177, %178 : vector<32x128xi32>
    %c0_i32_63 = arith.constant 0 : i32
    %180 = vector.broadcast %c0_i32_63 : i32 to vector<32x128xi32>
    %181 = arith.cmpi slt, %177, %180 : vector<32x128xi32>
    %c0_i32_64 = arith.constant 0 : i32
    %182 = arith.cmpi slt, %175, %c0_i32_64 : i32
    %183 = vector.broadcast %182 : i1 to vector<32x128xi1>
    %184 = vector.broadcast %183 : vector<32x128xi1> to vector<32x128xi1>
    %185 = arith.xori %181, %184 : vector<32x128xi1>
    %186 = arith.andi %185, %179 : vector<32x128xi1>
    %187 = vector.broadcast %175 : i32 to vector<32x128xi32>
    %188 = arith.addi %177, %187 : vector<32x128xi32>
    %189 = arith.select %186, %188, %177 : vector<32x128xi1>, vector<32x128xi32>
    %c15_i32_65 = arith.constant 15 : i32
    %190 = vector.broadcast %c15_i32_65 : i32 to vector<32x128xi32>
    %191 = arith.cmpi ne, %189, %190 : vector<32x128xi32>
    %c31_i32_66 = arith.constant 31 : i32
    %192 = tpu.dynamic_rotate %151 by %c31_i32_66 dim 0 : vector<32x128xf32>, i32 -> vector<32x128xf32>
    %cst_67 = arith.constant 0.000000e+00 : f32
    %193 = vector.broadcast %cst_67 : f32 to vector<32x128xf32>
    %194 = arith.select %191, %192, %193 : vector<32x128xi1>, vector<32x128xf32>
    %c0_68 = arith.constant 0 : index
    %c0_69 = arith.constant 0 : index
    %195 = vector.load %arg3[%c0_68, %c0_69] : memref<384x128xf32, #tpu.memory_space<vmem>>, vector<128x128xf32>
    %cst_70 = arith.constant dense<0.000000e+00> : vector<32x128xf32>
    %196 = tpu.matmul %173, %195, %cst_70 {dimension_numbers = #tpu.dot_dimension_numbers<[1], [0], [0], [1], [0, 0, 1, 1], [], []>} : vector<32x128xf32>, vector<128x128xf32>, vector<32x128xf32> -> vector<32x128xf32>
    %c128 = arith.constant 128 : index
    %c0_71 = arith.constant 0 : index
    %197 = vector.load %arg3[%c128, %c0_71] : memref<384x128xf32, #tpu.memory_space<vmem>>, vector<128x128xf32>
    %cst_72 = arith.constant dense<0.000000e+00> : vector<32x128xf32>
    %198 = tpu.matmul %151, %197, %cst_72 {dimension_numbers = #tpu.dot_dimension_numbers<[1], [0], [0], [1], [0, 0, 1, 1], [], []>} : vector<32x128xf32>, vector<128x128xf32>, vector<32x128xf32> -> vector<32x128xf32>
    %199 = arith.addf %196, %198 : vector<32x128xf32>
    %c256 = arith.constant 256 : index
    %c0_73 = arith.constant 0 : index
    %200 = vector.load %arg3[%c256, %c0_73] : memref<384x128xf32, #tpu.memory_space<vmem>>, vector<128x128xf32>
    %cst_74 = arith.constant dense<0.000000e+00> : vector<32x128xf32>
    %201 = tpu.matmul %194, %200, %cst_74 {dimension_numbers = #tpu.dot_dimension_numbers<[1], [0], [0], [1], [0, 0, 1, 1], [], []>} : vector<32x128xf32>, vector<128x128xf32>, vector<32x128xf32> -> vector<32x128xf32>
    %202 = arith.addf %199, %201 : vector<32x128xf32>
    %c2 = arith.constant 2 : index
    %c0_75 = arith.constant 0 : index
    %203 = vector.load %arg4[%c2, %c0_75] : memref<6x8xf32, #tpu.memory_space<vmem>>, vector<1x8xf32>
    %c3 = arith.constant 3 : index
    %c0_76 = arith.constant 0 : index
    %204 = vector.load %arg4[%c3, %c0_76] : memref<6x8xf32, #tpu.memory_space<vmem>>, vector<1x8xf32>
    %205 = arith.mulf %202, %202 : vector<32x128xf32>
    %206 = tpu.concatenate %202, %205 in 0 : vector<32x128xf32>, vector<32x128xf32> -> vector<64x128xf32>
    %cst_77 = arith.constant dense<0.000000e+00> : vector<64x8xf32>
    %207 = tpu.matmul %206, %20, %cst_77 {dimension_numbers = #tpu.dot_dimension_numbers<[1], [0], [0], [1], [0, 0, 1, 1], [], []>} : vector<64x128xf32>, vector<128x8xf32>, vector<64x8xf32> -> vector<64x8xf32>
    %208 = vector.extract_strided_slice %207 {offsets = [0, 0], sizes = [32, 8], strides = [1, 1]} : vector<64x8xf32> to vector<32x8xf32>
    %cst_78 = arith.constant dense<0.000000e+00> : vector<8xf32>
    %209 = vector.multi_reduction <add>, %208, %cst_78 [0] : vector<32x8xf32> to vector<8xf32>
    %210 = vector.shape_cast %209 : vector<8xf32> to vector<1x8xf32>
    %211 = vector.extract_strided_slice %207 {offsets = [32, 0], sizes = [32, 8], strides = [1, 1]} : vector<64x8xf32> to vector<32x8xf32>
    %cst_79 = arith.constant dense<0.000000e+00> : vector<8xf32>
    %212 = vector.multi_reduction <add>, %211, %cst_79 [0] : vector<32x8xf32> to vector<8xf32>
    %213 = vector.shape_cast %212 : vector<8xf32> to vector<1x8xf32>
    %cst_80 = arith.constant 0.001953125 : f32
    %214 = vector.broadcast %cst_80 : f32 to vector<1x8xf32>
    %215 = arith.mulf %210, %214 : vector<1x8xf32>
    %cst_81 = arith.constant 0.001953125 : f32
    %216 = vector.broadcast %cst_81 : f32 to vector<1x8xf32>
    %217 = arith.mulf %213, %216 : vector<1x8xf32>
    %218 = arith.mulf %215, %215 : vector<1x8xf32>
    %219 = arith.subf %217, %218 : vector<1x8xf32>
    %cst_82 = arith.constant 9.99999974E-6 : f32
    %220 = vector.broadcast %cst_82 : f32 to vector<1x8xf32>
    %221 = arith.addf %219, %220 : vector<1x8xf32>
    %222 = math.rsqrt %221 : vector<1x8xf32>
    %223 = arith.mulf %203, %222 : vector<1x8xf32>
    %224 = arith.mulf %215, %223 : vector<1x8xf32>
    %225 = arith.subf %204, %224 : vector<1x8xf32>
    %226 = tpu.concatenate %223, %225 in 0 : vector<1x8xf32>, vector<1x8xf32> -> vector<2x8xf32>
    %cst_83 = arith.constant dense<0.000000e+00> : vector<2x128xf32>
    %227 = tpu.matmul %226, %41, %cst_83 {dimension_numbers = #tpu.dot_dimension_numbers<[1], [0], [0], [1], [0, 0, 1, 1], [], []>} : vector<2x8xf32>, vector<8x128xf32>, vector<2x128xf32> -> vector<2x128xf32>
    %228 = vector.extract_strided_slice %227 {offsets = [0, 0], sizes = [1, 128], strides = [1, 1]} : vector<2x128xf32> to vector<1x128xf32>
    %229 = vector.extract_strided_slice %227 {offsets = [1, 0], sizes = [1, 128], strides = [1, 1]} : vector<2x128xf32> to vector<1x128xf32>
    %230 = vector.broadcast %228 : vector<1x128xf32> to vector<32x128xf32>
    %231 = arith.mulf %202, %230 : vector<32x128xf32>
    %232 = vector.broadcast %144 : vector<1x128xf32> to vector<32x128xf32>
    %233 = arith.mulf %95, %232 : vector<32x128xf32>
    %234 = arith.addf %231, %233 : vector<32x128xf32>
    %235 = arith.addf %229, %145 : vector<1x128xf32>
    %236 = vector.broadcast %235 : vector<1x128xf32> to vector<32x128xf32>
    %237 = arith.addf %234, %236 : vector<32x128xf32>
    %cst_84 = arith.constant 0.000000e+00 : f32
    %238 = vector.broadcast %cst_84 : f32 to vector<32x128xf32>
    %239 = arith.maximumf %237, %238 : vector<32x128xf32>
    %c0_85 = arith.constant 0 : index
    %c0_86 = arith.constant 0 : index
    %240 = vector.load %arg5[%c0_85, %c0_86] : memref<32x128xf32, #tpu.memory_space<vmem>>, vector<32x128xf32>
    tpu.vector_store %arg5[%c0_85, %c0_86], %239 {strides = array<i32>} : memref<32x128xf32, #tpu.memory_space<vmem>>, vector<32x128xf32>,
    return
  }
}

</mosaic_0001>

<bundles_post_ra>
// kernel: _forward_impl.1
= control target key start
LH: loop header
LB: loop body
LE: loop exit
PB: predicated region body
PF: predicated region fallthrough
CT: control target
= control target key end

     0   :  { %10 = vsyncpa [#allocation3], 0  ;;  %s2180_s18 = smov [#allocation2]   ;;  %s3029_s0 = inlined_call_operand.vmem [shape: f32[32,64], index: 0, kind: input, shape index: {}]   ;;  %s3030_s1 = inlined_call_operand.vmem [shape: f32[64,256], index: 1, kind: input, shape index: {}]   ;;  %s3031_s2 = inlined_call_operand.hbm [shape: f32[128,128], index: 2, kind: input, shape index: {}]   ;;  %s3032_s3 = inlined_call_operand.vmem [shape: f32[384,128], index: 3, kind: input, shape index: {}]   ;;  %s3033_s4 = inlined_call_operand.vmem [shape: f32[6,8], index: 4, kind: input, shape index: {}]   ;;  %s3034_s5 = inlined_call_operand.vmem [shape: f32[32,128], index: 5, kind: output, shape index: {}]  }
   0x1   :  { %s20_s19 = sshll.u32 %s2180_s18, 4  ;;  %s21_s19 = int_to_ptr.vmem [resolvable:$true] %s20_s19 }
   0x2   :  { %s2166_s20 = scalar_lea.vmem %s21_s19, 2048  ;;  %p2171_p1 = scmp.lt.s32.totalorder %s21_s19, %s21_s19 }
   0x3   :  { %p2167_p0 = scmp.ne.s32.totalorder %s21_s19, %s2166_s20  ;;  %p2172_p2 = scmp.lt.s32.totalorder %s2166_s20, %s2166_s20 }
   0x5   :  { %p2173_p3 = por %p2172_p2, %p2171_p1 }
   0x7   :  { %p2174_p4 = pnand %p2173_p3, %p2167_p0 }
   0x9   :  { %2177 = shalt.err (!%p2174_p4)
}
   0xa   :  { %s2181_s21 = smov 128   ;;  %s2182_s22 = smov 8  }
   0xb   :  { %26 = dma.hbm_to_vmem [thread:$0]  %s3031_s2, 2048, %s21_s19, [#allocation3], %s2181_s21, %s2181_s21, %s2182_s22  }
   0xc   :  { %2178 = dma.done.wait [#allocation3], 2048  }
   0xd   :  { %2179 = vsyncadd [#allocation3], 4294965248  ;;  %v2183_v0 = vmov 0.0   ;;  %v34_v1 = vlaneseq  ;;  %v409_v2 = vld [vmem:[%s3030_s1 + $0x78] sm:$0xff]  ;;  %v408_v4 = vld [vmem:[%s3030_s1 + $0x70] sm:$0xff]  ;;  %vm410_vm2 = vcmask 523264  }
   0xe   :  { %487 = vmatprep.mubr.f32.mxu0 %v2183_v0  ;;  %v519_v3 = vld [vmem:[#allocation2 + $0x38] sm:$0xff]  ;;  %439 = vmatprep.subr.mxu0 %v409_v2  ;;  %v407_v5 = vld [vmem:[%s3030_s1 + $0x68] sm:$0xff]  ;;  %v518_v6 = vld [vmem:[#allocation2 + $0x30] sm:$0xff]  ;;  %v2184_v56 = vmov 1.0  }
   0xf   :  { %1878 = vmatprep.subr.mxu1 %v519_v3  ;;  %v406_v7 = vld [vmem:[%s3030_s1 + $0x60] sm:$0xff]  ;;  %440 = vmatpush1.msra.mxu0 %v408_v4  ;;  %v405_v8 = vld [vmem:[%s3030_s1 + $0x58] sm:$0xff]  ;;  %v517_v9 = vld [vmem:[#allocation2 + $0x28] sm:$0xff]  ;;  %v2239_v11 = vshrl.u32 %v34_v1, 7  ;;  %v2309_v41 = vand.u32 127, %v34_v1 }
  0x10   :  { %1879 = vmatpush3.msra.mxu1 %v519_v3  ;;  %441 = vmatprep.subr.mxu0 %v407_v5  ;;  %v404_v10 = vld [vmem:[%s3030_s1 + $0x50] sm:$0xff]  ;;  %v403_v12 = vld [vmem:[%s3030_s1 + $0x48] sm:$0xff]  ;;  %v516_v13 = vld [vmem:[#allocation2 + $0x20] sm:$0xff] }
  0x11   :  { %1880 = vmatprep.subr.mxu1 %v518_v6  ;;  %442 = vmatpush1.msra.mxu0 %v406_v7  ;;  %v402_v14 = vld [vmem:[%s3030_s1 + $0x40] sm:$0xff]  ;;  %v401_v15 = vld [vmem:[%s3030_s1 + $0x38] sm:$0xff]  ;;  %v2251_v17 = vadd.s32 16, %v2239_v11  ;;  %v400_v18 = vld [vmem:[%s3030_s1 + $0x30] sm:$0xff]  ;;  %v316_v21 = vand.u32 15, %v2239_v11  ;;  %vm3036_vm0 = vcmp.lt.s32.totalorder %v2239_v11, 1 }
  0x12   :  { %1881 = vmatpush3.msra.mxu1 %v518_v6  ;;  %443 = vmatprep.subr.mxu0 %v405_v8  ;;  %v515_v16 = vld [vmem:[#allocation2 + $0x18] sm:$0xff]  ;;  %v399_v19 = vld [vmem:[%s3030_s1 + $0x28] sm:$0xff]  ;;  %v514_v20 = vld [vmem:[#allocation2 + $0x10] sm:$0xff]  ;;  %v50_v32 = vadd.s32 120, %v2239_v11  ;;  %v49_v50 = vadd.s32 112, %v2239_v11  ;;  %v2336_v53 = vadd.s32 8, %v2239_v11 }
  0x13   :  { %1882 = vmatprep.subr.mxu1 %v517_v9  ;;  %444 = vmatpush1.msra.mxu0 %v404_v10  ;;  %v2263_v22 = vld [vmem:[%s3029_s0] sm:$0xff]  ;;  %v2268_v23 = vld [vmem:[%s3029_s0 + $0x18] sm:$0xff]  ;;  %v2274_v24 = vld [vmem:[%s3029_s0 + $0x8] sm:$0xff]  ;;  %v330_v31 = vand.u32 15, %v2251_v17  ;;  %vm2294_vm1 = vcmp.ne.s32.totalorder %v316_v21, 0  ;;  %v48_v58 = vadd.s32 104, %v2239_v11 }
  0x14   :  { %1883 = vmatpush3.msra.mxu1 %v517_v9  ;;  %445 = vmatprep.subr.mxu0 %v403_v12  ;;  %v398_v25 = vld [vmem:[%s3030_s1 + $0x20] sm:$0xff]  ;;  %v364_v26 = vrot.slane %v2263_v22, 7  ;;  %v367_v27 = vrot.slane %v2268_v23, 7  ;;  %v397_v28 = vld [vmem:[%s3030_s1 + $0x18] sm:$0xff]  ;;  %v513_v29 = vld [vmem:[#allocation2 + $0x8] sm:$0xff]  ;;  %v365_v36 = vrot.slane %v2274_v24, 7 }
  0x15   :  { %1884 = vmatprep.subr.mxu1 %v516_v13  ;;  %446 = vmatpush1.msra.mxu0 %v402_v14  ;;  %v2287_v30 = vld [vmem:[%s3029_s0 + $0x10] sm:$0xff]  ;;  %v395_v38 = vld [vmem:[%s3030_s1 + $0x8] sm:$0xff]  ;;  %v512_v39 = vld [vmem:[#allocation2] sm:$0xff]  ;;  %vm2313_vm3 = vcmp.ne.s32.totalorder %v330_v31, 0  ;;  %v162_v45 = vand.u32 7, %v50_v32  ;;  %v155_v57 = vand.u32 7, %v49_v50 }
  0x16   :  { %1885 = vmatpush3.msra.mxu1 %v516_v13  ;;  %447 = vmatprep.subr.mxu0 %v401_v15  ;;  %v396_v33 = vld [vmem:[%s3030_s1 + $0x10] sm:$0xff]  ;;  %v372_v35 = vsel %vm3036_vm0, %v367_v27, %v364_v26  ;;  %v366_v37 = vrot.slane %v2287_v30, 7  ;;  %v394_v40 = vld [vmem:[%s3030_s1] sm:$0xff]  ;;  %v371_v46 = vsel %vm3036_vm0, %v364_v26, %v365_v36  ;;  %v628_v47 = vld [vmem:[#allocation2 + $0x78] sm:$0xff]  ;;  %v2348_v60 = vadd.s32 24, %v2239_v11 }
  0x17   :  { %1886 = vmatprep.subr.mxu1 %v515_v16  ;;  %448 = vmatpush1.msra.mxu0 %v400_v18  ;;  %v373_v42 = vsel %vm2294_vm1, %v372_v35, 0.0  ;;  %v627_v48 = vld [vmem:[#allocation2 + $0x70] sm:$0xff]  ;;  %vm2329_vm4 = vcmp.eq.s32.totalorder %v162_v45, %v2309_v41  ;;  %v626_v52 = vld [vmem:[#allocation2 + $0x68] sm:$0xff]  ;;  %v625_v54 = vld [vmem:[#allocation2 + $0x60] sm:$0xff]  ;;  %v47_v61 = vadd.s32 96, %v2239_v11  ;;  %v383_v62 = vrot.slane %v2287_v30, 1 }
  0x18   :  { %1887 = vmatpush3.msra.mxu1 %v515_v16  ;;  %449 = vmatprep.subr.mxu0 %v399_v19  ;;  %v370_v44 = vsel %vm3036_vm0, %v365_v36, %v366_v37  ;;  %v369_v55 = vsel %vm3036_vm0, %v366_v37, %v367_v27  ;;  %v624_v59 = vld [vmem:[#allocation2 + $0x58] sm:$0xff]  ;;  %v381_v63 = vrot.slane %v2263_v22, 1  ;;  %v382_v1 = vrot.slane %v2274_v24, 1  ;;  %v623_v3 = vld [vmem:[#allocation2 + $0x50] sm:$0xff]  ;;  %v622_v7 = vld [vmem:[#allocation2 + $0x48] sm:$0xff] }
  0x19   :  { %1888 = vmatprep.subr.mxu1 %v514_v20  ;;  %450 = vmatpush1.msra.mxu0 %v398_v25  ;;  %v375_v49 = vsel %vm2313_vm3, %v370_v44, 0.0  ;;  %v323_v2 = vand.u32 15, %v2336_v53  ;;  %vm3035_vm5 = vcmp.lt.s32.totalorder %v2239_v11, 7  ;;  %vm2361_vm6 = vcmp.eq.s32.totalorder %v155_v57, %v2309_v41  ;;  %v621_v15 = vld [vmem:[#allocation2 + $0x40] sm:$0xff]  ;;  %v1302_v43 = vld [vmem:[%s3032_s3 + $0x150] sm:$0xff]  ;;  %v1299_v4 = vld [vmem:[%s3032_s3 + $0x138] sm:$0xff] }
  0x1a   :  { %1889 = vmatpush3.msra.mxu1 %v514_v20  ;;  %451 = vmatprep.subr.mxu0 %v397_v28  ;;  %v148_v5 = vand.u32 7, %v48_v58  ;;  %v46_v6 = vadd.s32 88, %v2239_v11  ;;  %v337_v8 = vand.u32 15, %v2348_v60  ;;  %v141_v9 = vand.u32 7, %v47_v61  ;;  %v1300_v51 = vld [vmem:[%s3032_s3 + $0x140] sm:$0xff]  ;;  %v1298_v16 = vld [vmem:[%s3032_s3 + $0x130] sm:$0xff] }
  0x1b   :  { %1890 = vmatprep.subr.mxu1 %v513_v29  ;;  %452 = vmatpush1.msra.mxu0 %v396_v33  ;;  %v388_v10 = vsel %vm3035_vm5, %v381_v63, %v382_v1  ;;  %vm2372_vm7 = vcmp.ne.s32.totalorder %v323_v2, 15  ;;  %v3062_v12 = vmov 0  ;;  %v387_v13 = vsel %vm3035_vm5, %v382_v1, %v383_v62  ;;  %v1297_v20 = vld [vmem:[%s3032_s3 + $0x128] sm:$0xff]  ;;  %v1294_v32 = vld [vmem:[%s3032_s3 + $0x110] sm:$0xff] }
  0x1c   :  { %1891 = vmatpush3.msra.mxu1 %v513_v29  ;;  %453 = vmatprep.subr.mxu0 %v395_v38  ;;  %v3063_v12 = vsel %vm2372_vm7, 4294967295, %v3062_v12  ;;  %v384_v14 = vrot.slane %v2268_v23, 1  ;;  %vm2386_vm8 = vcmp.eq.s32.totalorder %v148_v5, %v2309_v41  ;;  %v134_v18 = vand.u32 7, %v46_v6  ;;  %v1295_v29 = vld [vmem:[%s3032_s3 + $0x118] sm:$0xff]  ;;  %v1293_v36 = vld [vmem:[%s3032_s3 + $0x108] sm:$0xff] }
  0x1d   :  { %1892 = vmatprep.subr.mxu1 %v512_v39  ;;  %454 = vmatpush1.msra.mxu0 %v394_v40  ;;  %v391_v19 = vsel %vm2372_vm7, %v387_v13, 0.0  ;;  %vm2396_vm9 = vcmp.eq.s32.totalorder %v141_v9, %v2309_v41  ;;  %vm2402_vm10 = vcmp.ne.s32.totalorder %v337_v8, 15  ;;  %v45_v26 = vadd.s32 80, %v2239_v11 }
  0x1e   :  { %1893 = vmatpush3.msra.mxu1 %v512_v39  ;;  %1894 = vmatprep.mubr.msk.f32.mxu1 %vm410_vm2, %v373_v42  ;;  %v386_v21 = vsel %vm3035_vm5, %v383_v62, %v384_v14  ;;  %vm2415_vm11 = vcmp.eq.s32.totalorder %v134_v18, %v2309_v41  ;;  %v44_v28 = vadd.s32 72, %v2239_v11  ;;  %v43_v31 = vadd.s32 64, %v2239_v11  ;;  %v1292_v39 = vld [vmem:[%s3032_s3 + $0x100] sm:$0xff] }
  0x1f   :  { %1682 = vmatmul.mubr.msk.f32.vlgmr.msra.gmra.mxu0 %vm410_vm2, %v2263_v22  ;;  %1895 = vmatmul.mubr.msk.f32.vlgmr.msra.gmra.mxu1 %vm410_vm2, %v371_v46  ;;  %v3068_v22 = vmov 0  ;;  %v127_v27 = vand.u32 7, %v45_v26  ;;  %v42_v35 = vadd.s32 56, %v2239_v11  ;;  %v41_v38 = vadd.s32 48, %v2239_v11 }
  0x20   :  { %1900 = vmatprep.subr.mxu0 %v628_v47  ;;  %493 = vmatprep.mubr.f32.mxu0 %v2183_v0  ;;  %v3069_v22 = vsel %vm2402_vm10, 4294967295, %v3068_v22  ;;  %v113_v33 = vand.u32 7, %v43_v31  ;;  %v40_v42 = vadd.s32 40, %v2239_v11  ;;  %v39_v46 = vadd.s32 32, %v2239_v11 }
  0x21   :  { %1901 = vmatpush3.msra.mxu0 %v628_v47  ;;  %1897 = vmatprep.mubr.msk.f32.mxu1 %vm410_vm2, %v375_v49  ;;  %vm2440_vm12 = vcmp.eq.s32.totalorder %v127_v27, %v2309_v41  ;;  %v106_v37 = vand.u32 7, %v42_v35  ;;  %v99_v40 = vand.u32 7, %v41_v38  ;;  %v3082_v47 = vmov 0 }
  0x22   :  { %1902 = vmatprep.subr.mxu0 %v627_v48  ;;  %1922 = vmatprep.subr.msk.mxu1 %vm2329_vm4, %v2184_v56  ;;  %vm2464_vm14 = vcmp.eq.s32.totalorder %v113_v33, %v2309_v41  ;;  %v92_v45 = vand.u32 7, %v40_v42  ;;  %v3084_v49 = vmov 0  ;;  %v78_v50 = vand.u32 7, %v2348_v60 }
  0x23   :  { %1903 = vmatpush3.msra.mxu0 %v627_v48  ;;  %1898 = vmatmul.mubr.msk.f32.gmra.mxu1 %vm410_vm2, %v369_v55  ;;  %vm2476_vm15 = vcmp.eq.s32.totalorder %v106_v37, %v2309_v41  ;;  %v85_v48 = vand.u32 7, %v39_v46  ;;  %v3088_v55 = vmov 0  ;;  %v64_v57 = vand.u32 7, %v2336_v53  ;;  %v2623_v46 = vld [vmem:[%s3032_s3 + $0xf8] sm:$0xff] }
  0x24   :  { %1683 = vmatmul.mubr.msk.f32.gmra.mxu0 %vm410_vm2, %v2274_v24  ;;  %1904 = vmatprep.subr.mxu0 %v626_v52  ;;  %v57_v58 = vand.u32 7, %v2239_v11  ;;  %v3092_v53 = vmov 0  ;;  %v297_v42 = vand.u32 7, %v2309_v41  ;;  %v1296_v24 = vld [vmem:[%s3032_s3 + $0x120] sm:$0xff] }
  0x25   :  { %1905 = vmatpush3.msra.mxu0 %v626_v52  ;;  %499 = vmatprep.mubr.f32.mxu0 %v2183_v0  ;;  %vm2511_vm0 = vcmp.eq.s32.totalorder %v85_v48, %v2309_v41  ;;  %v3086_v52 = vmov 0  ;;  %v1104_v48 = vld [vmem:[%s3032_s3 + $0x70] sm:$0xff] }
  0x26   :  { %1906 = vmatprep.subr.mxu0 %v625_v54  ;;  %1923 = vmatpush3.msk.msra.mxu1 %vm2329_vm4, %v2184_v56  ;;  %v3085_v49 = vsel %vm2511_vm0, 4294967295, %v3084_v49 }
  0x27   :  { %1907 = vmatpush3.msra.mxu0 %v625_v54  ;;  %1924 = vmatprep.subr.msk.mxu1 %vm2361_vm6, %v2184_v56  ;;  %v71_v54 = vand.u32 7, %v2251_v17  ;;  %v3090_v17 = vmov 0 }
  0x28   :  { %1684 = vmatmul.mubr.msk.f32.gmra.mxu0 %vm410_vm2, %v2287_v30  ;;  %1908 = vmatprep.subr.mxu0 %v624_v59  ;;  %v120_v30 = vand.u32 7, %v44_v28 }
  0x29   :  { %1909 = vmatpush3.msra.mxu0 %v624_v59  ;;  %505 = vmatprep.mubr.f32.mxu0 %v2183_v0  ;;  %vm2535_vm7 = vcmp.eq.s32.totalorder %v71_v54, %v2309_v41  ;;  %v1102_v54 = vld [vmem:[%s3032_s3 + $0x60] sm:$0xff] }
  0x2a   :  { %1910 = vmatprep.subr.mxu0 %v623_v3  ;;  %1925 = vmatpush3.msk.msra.mxu1 %vm2361_vm6, %v2184_v56  ;;  %vm2452_vm13 = vcmp.eq.s32.totalorder %v120_v30, %v2309_v41  ;;  %v3089_v55 = vsel %vm2535_vm7, 4294967295, %v3088_v55 }
  0x2b   :  { %1911 = vmatpush3.msra.mxu0 %v623_v3  ;;  %1926 = vmatprep.subr.msk.mxu1 %vm2386_vm8, %v2184_v56 }
  0x2c   :  { %1685 = vmatmul.mubr.msk.f32.gmra.mxu0 %vm410_vm2, %v2268_v23  ;;  %1912 = vmatprep.subr.mxu0 %v622_v7  ;;  %v389_v23 = vsel %vm3035_vm5, %v384_v14, %v381_v63  ;;  %vm2500_vm5 = vcmp.eq.s32.totalorder %v92_v45, %v2309_v41  ;;  %v3094_v45 = vmov 0 }
  0x2d   :  { %1913 = vmatpush3.msra.mxu0 %v622_v7  ;;  %1916 = vmatprep.mubr.msk.f32.mxu0 %vm410_vm2, %v388_v10  ;;  %v393_v25 = vsel %vm2402_vm10, %v389_v23, 0.0  ;;  %v3083_v47 = vsel %vm2500_vm5, 4294967295, %v3082_v47  ;;  %vm2523_vm10 = vcmp.eq.s32.totalorder %v78_v50, %v2309_v41  ;;  %v1103_v50 = vld [vmem:[%s3032_s3 + $0x68] sm:$0xff] }
  0x2e   :  { %1914 = vmatprep.subr.mxu0 %v621_v15  ;;  %1927 = vmatpush3.msk.msra.mxu1 %vm2386_vm8, %v2184_v56  ;;  %v3087_v52 = vsel %vm2523_vm10, 4294967295, %v3086_v52 }
  0x2f   :  { %1915 = vmatpush3.msra.mxu0 %v621_v15  ;;  %1928 = vmatprep.subr.msk.mxu1 %vm2396_vm9, %v2184_v56 }
  0x30   :  { %1917 = vmatmul.mubr.msk.f32.vlgmr.msra.gmra.mxu0 %vm410_vm2, %v391_v19  ;;  %1929 = vmatpush3.msk.msra.mxu1 %vm2396_vm9, %v2184_v56 }
  0x31   :  { %1919 = vmatprep.mubr.msk.f32.mxu0 %vm410_vm2, %v386_v21  ;;  %1930 = vmatprep.subr.msk.mxu1 %vm2415_vm11, %v2184_v56 }
  0x32   :  { %1978 = vmatprep.subr.mxu0 %v2183_v0  ;;  %1931 = vmatpush3.msk.msra.mxu1 %vm2415_vm11, %v2184_v56 }
  0x33   :  { %1932 = vmatprep.subr.msk.mxu1 %vm2440_vm12, %v2184_v56 }
  0x34   :  { %1920 = vmatmul.mubr.msk.f32.gmra.mxu0 %vm410_vm2, %v393_v25  ;;  %1933 = vmatpush3.msk.msra.mxu1 %vm2440_vm12, %v2184_v56  ;;  %vm2488_vm2 = vcmp.eq.s32.totalorder %v99_v40, %v2309_v41 }
  0x35   :  { %1934 = vmatprep.subr.msk.mxu1 %vm2452_vm13, %v2184_v56 }
  0x36   :  { %1935 = vmatpush3.msk.msra.mxu1 %vm2452_vm13, %v2184_v56 }
  0x37   :  { %1936 = vmatprep.subr.msk.mxu1 %vm2464_vm14, %v2184_v56 }
  0x38   :  { %1937 = vmatpush3.msk.msra.mxu1 %vm2464_vm14, %v2184_v56 }
  0x39   :  { %1938 = vmatprep.subr.msk.mxu1 %vm2476_vm15, %v2184_v56 }
  0x3a   :  { %1939 = vmatpush3.msk.msra.mxu1 %vm2476_vm15, %v2184_v56 }
  0x3b   :  { %1940 = vmatprep.subr.msk.mxu1 %vm2488_vm2, %v2184_v56 }
  0x3c   :  { %1941 = vmatpush3.msk.msra.mxu1 %vm2488_vm2, %v2184_v56 }
  0x3d   :  { %1942 = vmatprep.subr.msk.mxu1 %vm2500_vm5, %v2184_v56 }
  0x3e   :  { %1943 = vmatpush3.msk.msra.mxu1 %vm2500_vm5, %v2184_v56  ;;  %vm3096_vm5 = vcmask 64512  }
  0x3f   :  { %1944 = vmatprep.subr.msk.mxu1 %vm2511_vm0, %v2184_v56 }
  0x40   :  { %1945 = vmatpush3.msk.msra.mxu1 %vm2511_vm0, %v2184_v56  ;;  %vm2547_vm0 = vcmp.eq.s32.totalorder %v64_v57, %v2309_v41  ;;  %v1101_v57 = vld [vmem:[%s3032_s3 + $0x58] sm:$0xff] }
  0x41   :  { %1946 = vmatprep.subr.msk.mxu1 %vm2523_vm10, %v2184_v56  ;;  %v3091_v17 = vsel %vm2547_vm0, 4294967295, %v3090_v17 }
  0x42   :  { %1947 = vmatpush3.msk.msra.mxu1 %vm2523_vm10, %v2184_v56  ;;  %vm2559_vm10 = vcmp.eq.s32.totalorder %v57_v58, %v2309_v41  ;;  %v1105_v41 = vld [vmem:[%s3032_s3 + $0x78] sm:$0xff]  ;;  %v1100_v58 = vld [vmem:[%s3032_s3 + $0x50] sm:$0xff] }
  0x43   :  { %1948 = vmatprep.subr.msk.mxu1 %vm2535_vm7, %v2184_v56  ;;  %v3093_v53 = vsel %vm2559_vm10, 4294967295, %v3092_v53 }
  0x44   :  { %1949 = vmatpush3.msk.msra.mxu1 %vm2535_vm7, %v2184_v56  ;;  %vm971_vm7 = vcmask 1042432  }
  0x45   :  { %1950 = vmatprep.subr.msk.mxu1 %vm2547_vm0, %v2184_v56 }
  0x46   :  { %1951 = vmatpush3.msk.msra.mxu1 %vm2547_vm0, %v2184_v56  ;;  %vm2613_vm0 = vcmp.eq.s32.totalorder %v297_v42, %v2239_v11 }
  0x47   :  { %1952 = vmatprep.subr.msk.mxu1 %vm2559_vm10, %v2184_v56  ;;  %v3095_v45 = vsel %vm2613_vm0, 4294967295, %v3094_v45  ;;  %1979 = vmatpush3.msk.msra.mxu0 %vm2613_vm0, %v2184_v56  ;;  %vm969_vm0 = vcmask 1041408  }
  0x48   :  { %1953 = vmatpush3.msk.msra.mxu1 %vm2559_vm10, %v2184_v56  ;;  %vm3047_vm10 = vmmov 0   ;;  %1983 = vmatprep.subr.mxu0 %v2623_v46 }
  0x49   :  { %1980 = vmatprep.mubr.msk.f32.mxu0 %vm3047_vm10, %v2183_v0  ;;  %2021 = vmatprep.subr.mxu1 %v1105_v41  ;;  %vm3048_vm10 = vcmask 64512  }
  0xdf   :  { %v489_v59 = vpop.f32.mrf.mxu0  ;;  %v1896_v63 = vpop.f32.mrf.mxu1 }
  0xe1   :  { %v2569_v60 = vpop.f32.mrf.mxu0  ;;  %v598_v3 = vpop.f32.mrf.mxu1 }
  0xe2   :  { %v617_v9 = vadd.f32 %v598_v3, %v489_v59  ;;  %v738_v35 = vmul.f32 %v2569_v60, %v2569_v60  ;;  %v1099_v59 = vld [vmem:[%s3032_s3 + $0x48] sm:$0xff] }
  0xe3   :  { %v1899_v6 = vpop.f32.mrf.mxu1 }
  0xe4   :  { %v495_v61 = vpop.f32.mrf.mxu0 }
  0xe5   :  { %v618_v10 = vadd.f32 %v1896_v63, %v495_v61  ;;  %v608_v13 = vpop.f32.mrf.mxu1  ;;  %v1098_v61 = vld [vmem:[%s3032_s3 + $0x40] sm:$0xff]  ;;  %v1097_v63 = vld [vmem:[%s3032_s3 + $0x38] sm:$0xff] }
  0xe6   :  { %v2571_v62 = vpop.f32.mrf.mxu0 }
  0xe7   :  { %v739_v37 = vmul.f32 %v2571_v62, %v2571_v62 }
  0xe8   :  { %v501_v1 = vpop.f32.mrf.mxu0 }
  0xe9   :  { %v619_v21 = vadd.f32 %v608_v13, %v501_v1  ;;  %v1096_v1 = vld [vmem:[%s3032_s3 + $0x30] sm:$0xff] }
  0xea   :  { %v2573_v2 = vpop.f32.mrf.mxu0 }
  0xeb   :  { %v740_v38 = vmul.f32 %v2573_v2, %v2573_v2 }
  0xec   :  { %v507_v5 = vpop.f32.mrf.mxu0 }
  0xed   :  { %v620_v23 = vadd.f32 %v1899_v6, %v507_v5 }
  0xee   :  { %v2575_v7 = vpop.f32.mrf.mxu0 }
  0xef   :  { %v741_v40 = vmul.f32 %v2575_v7, %v2575_v7 }
  0xf0   :  { %v1918_v8 = vpop.f32.mrf.mxu0 }
  0xf1   :  { %v2579_v18 = vadd.f32 %v1918_v8, %v618_v10 }
  0xf2   :  { %v707_v14 = vpop.f32.mrf.mxu0 }
  0xf3   :  { %v2577_v15 = vadd.f32 %v707_v14, %v617_v9  ;;  %v735_v30 = vmul.f32 %v2579_v18, %v2579_v18 }
  0xf4   :  { %v1921_v19 = vpop.f32.mrf.mxu0 }
  0xf5   :  { %1954 = vmatprep.mubr.f32.mxu1 %v2577_v15  ;;  %v2585_v27 = vadd.f32 %v1921_v19, %v620_v23  ;;  %v734_v28 = vmul.f32 %v2577_v15, %v2577_v15 }
  0xf6   :  { %v717_v25 = vpop.f32.mrf.mxu0  ;;  %1955 = vmatmul.mubr.f32.vlgmr.msra.gmra.mxu1 %v2579_v18 }
  0xf7   :  { %v2583_v26 = vadd.f32 %v717_v25, %v619_v21  ;;  %v737_v33 = vmul.f32 %v2585_v27, %v2585_v27  ;;  %2022 = vmatpush3.msra.mxu1 %v1105_v41 }
  0xf8   :  { %2023 = vmatprep.subr.mxu1 %v1104_v48 }
  0xf9   :  { %1957 = vmatprep.mubr.f32.mxu1 %v2583_v26  ;;  %v736_v31 = vmul.f32 %v2583_v26, %v2583_v26  ;;  %2024 = vmatpush3.msra.mxu1 %v1104_v48 }
  0xfa   :  { %1958 = vmatmul.mubr.f32.gmra.mxu1 %v2585_v27  ;;  %2025 = vmatprep.subr.mxu1 %v1103_v50 }
  0xfb   :  { %1960 = vmatprep.mubr.f32.mxu1 %v734_v28  ;;  %2026 = vmatpush3.msra.mxu1 %v1103_v50 }
  0xfc   :  { %2027 = vmatprep.subr.mxu1 %v1102_v54 }
  0xfd   :  { %2028 = vmatpush3.msra.mxu1 %v1102_v54 }
  0xfe   :  { %1961 = vmatmul.mubr.f32.gmra.mxu1 %v735_v30  ;;  %2029 = vmatprep.subr.mxu1 %v1101_v57 }
  0xff   :  { %1963 = vmatprep.mubr.f32.mxu1 %v736_v31  ;;  %2030 = vmatpush3.msra.mxu1 %v1101_v57 }
 0x100   :  { %2031 = vmatprep.subr.mxu1 %v1100_v58 }
 0x101   :  { %2032 = vmatpush3.msra.mxu1 %v1100_v58 }
 0x102   :  { %1964 = vmatmul.mubr.f32.gmra.mxu1 %v737_v33  ;;  %2033 = vmatprep.subr.mxu1 %v1099_v59 }
 0x103   :  { %1966 = vmatprep.mubr.f32.mxu1 %v2569_v60  ;;  %2034 = vmatpush3.msra.mxu1 %v1099_v59 }
 0x104   :  { %2035 = vmatprep.subr.mxu1 %v1098_v61 }
 0x105   :  { %2036 = vmatpush3.msra.mxu1 %v1098_v61 }
 0x106   :  { %1967 = vmatmul.mubr.f32.gmra.mxu1 %v2571_v62  ;;  %2037 = vmatprep.subr.mxu1 %v1097_v63 }
 0x107   :  { %1969 = vmatprep.mubr.f32.mxu1 %v2573_v2  ;;  %2038 = vmatpush3.msra.mxu1 %v1097_v63 }
 0x108   :  { %2039 = vmatprep.subr.mxu1 %v1096_v1 }
 0x109   :  { %2040 = vmatpush3.msra.mxu1 %v1096_v1 }
 0x10a   :  { %1970 = vmatmul.mubr.f32.gmra.mxu1 %v2575_v7 }
 0x10b   :  { %1972 = vmatprep.mubr.f32.mxu1 %v738_v35 }
 0x10e   :  { %1973 = vmatmul.mubr.f32.gmra.mxu1 %v739_v37 }
 0x10f   :  { %1975 = vmatprep.mubr.f32.mxu1 %v740_v38 }
 0x112   :  { %1976 = vmatmul.mubr.f32.gmra.mxu1 %v741_v40 }
 0x1b6   :  { %v1956_v3 = vpop.f32.mrf.mxu1 }
 0x1b7   :  { %v889_v9 = vsel %vm3048_vm10, %v1956_v3, 0.0 }
 0x1b8   :  { %v808_v5 = vpop.f32.mrf.mxu1 }
 0x1b9   :  { %v888_v6 = vsel %vm3048_vm10, %v808_v5, 0.0 }
 0x1ba   :  { %v1959_v8 = vpop.f32.mrf.mxu1  ;;  %v890_v10 = vadd.f32 %v889_v9, %v888_v6 }
 0x1bb   :  { %v893_v23 = vsel %vm3048_vm10, %v1959_v8, 0.0 }
 0x1bc   :  { %v818_v13 = vpop.f32.mrf.mxu1 }
 0x1bd   :  { %v891_v14 = vsel %vm3048_vm10, %v818_v13, 0.0 }
 0x1be   :  { %v892_v19 = vadd.f32 %v891_v14, %v890_v10  ;;  %v1962_v21 = vpop.f32.mrf.mxu1 }
 0x1bf   :  { %v902_v35 = vsel %vm3048_vm10, %v1962_v21, 0.0 }
 0x1c0   :  { %v894_v25 = vadd.f32 %v893_v23, %v892_v19  ;;  %v828_v28 = vpop.f32.mrf.mxu1 }
 0x1c1   :  { %v901_v30 = vsel %vm3048_vm10, %v828_v28, 0.0 }
 0x1c2   :  { %v895_v31 = vrot.slane %v894_v25, 4  ;;  %v1965_v33 = vpop.f32.mrf.mxu1  ;;  %v903_v38 = vadd.f32 %v902_v35, %v901_v30 }
 0x1c3   :  { %v906_v54 = vsel %vm3048_vm10, %v1965_v33, 0.0 }
 0x1c4   :  { %v896_v37 = vadd.f32 %v895_v31, %v894_v25  ;;  %v838_v40 = vpop.f32.mrf.mxu1 }
 0x1c5   :  { %v904_v42 = vsel %vm3048_vm10, %v838_v40, 0.0 }
 0x1c6   :  { %v897_v41 = vrot.slane %v896_v37, 2  ;;  %v905_v48 = vadd.f32 %v904_v42, %v903_v38  ;;  %v1968_v50 = vpop.f32.mrf.mxu1 }
 0x1c7   :  { %v924_v5 = vsel %vm3048_vm10, %v1968_v50, 0.0 }
 0x1c8   :  { %v898_v57 = vadd.f32 %v897_v41, %v896_v37  ;;  %v907_v58 = vadd.f32 %v906_v54, %v905_v48  ;;  %v848_v59 = vpop.f32.mrf.mxu1 }
 0x1c9   :  { %v923_v61 = vsel %vm3048_vm10, %v848_v59, 0.0 }
 0x1ca   :  { %v899_v63 = vrot.slane %v898_v57, 1  ;;  %v908_v1 = vrot.slane %v907_v58, 4  ;;  %v1971_v3 = vpop.f32.mrf.mxu1  ;;  %v925_v8 = vadd.f32 %v924_v5, %v923_v61 }
 0x1cb   :  { %v928_v23 = vsel %vm3048_vm10, %v1971_v3, 0.0 }
 0x1cc   :  { %v909_v6 = vadd.f32 %v908_v1, %v907_v58  ;;  %v858_v9 = vpop.f32.mrf.mxu1  ;;  %v900_v13 = vadd.f32 %v899_v63, %v898_v57 }
 0x1cd   :  { %v926_v10 = vsel %vm3048_vm10, %v858_v9, 0.0 }
 0x1ce   :  { %v910_v14 = vrot.slane %v909_v6, 2  ;;  %v927_v19 = vadd.f32 %v926_v10, %v925_v8  ;;  %v1974_v21 = vpop.f32.mrf.mxu1  ;;  %v914_v33 = vmul.f32 0.001953125, %v900_v13 }
 0x1cf   :  { %v937_v40 = vsel %vm3048_vm10, %v1974_v21, 0.0 }
 0x1d0   :  { %v911_v25 = vadd.f32 %v910_v14, %v909_v6  ;;  %v929_v28 = vadd.f32 %v928_v23, %v927_v19  ;;  %v868_v30 = vpop.f32.mrf.mxu1  ;;  %v916_v57 = vmul.f32 %v914_v33, %v914_v33 }
 0x1d1   :  { %v936_v31 = vsel %vm3048_vm10, %v868_v30, 0.0 }
 0x1d2   :  { %v912_v35 = vrot.slane %v911_v25, 1  ;;  %v930_v37 = vrot.slane %v929_v28, 4  ;;  %v1977_v38 = vpop.f32.mrf.mxu1  ;;  %v938_v48 = vadd.f32 %v937_v40, %v936_v31 }
 0x1d3   :  { %v941_v63 = vsel %vm3048_vm10, %v1977_v38, 0.0  ;;  %v730_v38 = vld [vmem:[%s3033_s4] sm:$0x1] }
 0x1d4   :  { %v913_v42 = vadd.f32 %v912_v35, %v911_v25  ;;  %v931_v41 = vadd.f32 %v930_v37, %v929_v28  ;;  %v878_v50 = vpop.f32.mrf.mxu1 }
 0x1d5   :  { %v939_v54 = vsel %vm3048_vm10, %v878_v50, 0.0  ;;  %vm967_vm10 = vcmask 1040384  }
 0x1d6   :  { %v915_v58 = vmul.f32 0.001953125, %v913_v42  ;;  %v932_v59 = vrot.slane %v931_v41, 2  ;;  %v940_v61 = vadd.f32 %v939_v54, %v938_v48  ;;  %v731_v48 = vld [vmem:[%s3033_s4 + $0x4] sm:$0x1] }
 0x1d8   :  { %v917_v1 = vsub.f32 %v915_v58, %v916_v57  ;;  %v933_v3 = vadd.f32 %v932_v59, %v931_v41  ;;  %v942_v5 = vadd.f32 %v941_v63, %v940_v61  ;;  %v732_v41 = vld [vmem:[%s3033_s4 + $0x1] sm:$0x1]  ;;  %v733_v58 = vld [vmem:[%s3033_s4 + $0x5] sm:$0x1] }
 0x1da   :  { %v934_v6 = vrot.slane %v933_v3, 1  ;;  %v943_v8 = vrot.slane %v942_v5, 4  ;;  %v918_v9 = vadd.f32 1e-05, %v917_v1 }
 0x1dc   :  { %v944_v10 = vadd.f32 %v943_v8, %v942_v5  ;;  %v935_v13 = vadd.f32 %v934_v6, %v933_v3  ;;  %2152 = vrsqrt.f32 %v918_v9  ;;  %v1120_v8 = vld [vmem:[%s3032_s3 + $0xf0] sm:$0xff]  ;;  %v1119_v9 = vld [vmem:[%s3032_s3 + $0xe8] sm:$0xff] }
 0x1de   :  { %v945_v14 = vrot.slane %v944_v10, 2  ;;  %v949_v21 = vmul.f32 0.001953125, %v935_v13  ;;  %v1117_v13 = vld [vmem:[%s3032_s3 + $0xd8] sm:$0xff] }
 0x1e0   :  { %v946_v19 = vadd.f32 %v945_v14, %v944_v10  ;;  %v951_v28 = vmul.f32 %v949_v21, %v949_v21  ;;  %v1118_v10 = vld [vmem:[%s3032_s3 + $0xe0] sm:$0xff]  ;;  %v1115_v14 = vld [vmem:[%s3032_s3 + $0xc8] sm:$0xff] }
 0x1e2   :  { %v947_v23 = vrot.slane %v946_v19, 1 }
 0x1e4   :  { %v948_v25 = vadd.f32 %v947_v23, %v946_v19  ;;  %v1114_v19 = vld [vmem:[%s3032_s3 + $0xc0] sm:$0xff]  ;;  %v1112_v23 = vld [vmem:[%s3032_s3 + $0xb0] sm:$0xff] }
 0x1e6   :  { %v950_v30 = vmul.f32 0.001953125, %v948_v25  ;;  %v1111_v25 = vld [vmem:[%s3032_s3 + $0xa8] sm:$0xff] }
 0x1e8   :  { %v952_v31 = vsub.f32 %v950_v30, %v951_v28  ;;  %v1110_v28 = vld [vmem:[%s3032_s3 + $0xa0] sm:$0xff]  ;;  %v1109_v30 = vld [vmem:[%s3032_s3 + $0x98] sm:$0xff] }
 0x1e9   :  { %v2153_v37 = vpop.eup %2152 }
 0x1ea   :  { %v953_v35 = vadd.f32 1e-05, %v952_v31  ;;  %v920_v40 = vmul.f32 %v2153_v37, %v730_v38  ;;  %v1095_v31 = vld [vmem:[%s3032_s3 + $0x28] sm:$0xff]  ;;  %v1094_v37 = vld [vmem:[%s3032_s3 + $0x20] sm:$0xff] }
 0x1eb   :  { %2041 = vmatprep.subr.mxu1 %v1095_v31  ;;  %v1107_v38 = vld [vmem:[%s3032_s3 + $0x88] sm:$0xff] }
 0x1ec   :  { %2154 = vrsqrt.f32 %v953_v35  ;;  %v921_v42 = vmul.f32 %v920_v40, %v914_v33  ;;  %2042 = vmatpush3.msra.mxu1 %v1095_v31  ;;  %v1108_v35 = vld [vmem:[%s3032_s3 + $0x90] sm:$0xff] }
 0x1ed   :  { %2043 = vmatprep.subr.mxu1 %v1094_v37 }
 0x1ee   :  { %v922_v50 = vsub.f32 %v732_v41, %v921_v42  ;;  %2044 = vmatpush3.msra.mxu1 %v1094_v37  ;;  %v1106_v42 = vld [vmem:[%s3032_s3 + $0x80] sm:$0xff]  ;;  %v1092_v41 = vld [vmem:[%s3032_s3 + $0x10] sm:$0xff] }
 0x1ef   :  { %v1304_v37 = vld [vmem:[%s3032_s3 + $0x160] sm:$0xff] }
 0x1f0   :  { %v959_v61 = vrot.slane %v922_v50, 7  ;;  %v1307_v50 = vld [vmem:[%s3032_s3 + $0x178] sm:$0xff] }
 0x1f2   :  { %v968_v3 = vsel %vm967_vm10, %v920_v40, %v959_v61  ;;  %v1093_v40 = vld [vmem:[%s3032_s3 + $0x18] sm:$0xff] }
 0x1f3   :  { %2045 = vmatprep.subr.mxu1 %v1093_v40 }
 0x1f4   :  { %2046 = vmatpush3.msra.mxu1 %v1093_v40  ;;  %v1303_v40 = vld [vmem:[%s3032_s3 + $0x158] sm:$0xff] }
 0x1f5   :  { %2047 = vmatprep.subr.mxu1 %v1092_v41 }
 0x1f6   :  { %2048 = vmatpush3.msra.mxu1 %v1092_v41  ;;  %v1301_v41 = vld [vmem:[%s3032_s3 + $0x148] sm:$0xff] }
 0x1f9   :  { %v2155_v54 = vpop.eup %2154 }
 0x1fa   :  { %v955_v57 = vmul.f32 %v2155_v54, %v731_v48  ;;  %v1091_v48 = vld [vmem:[%s3032_s3 + $0x8] sm:$0xff]  ;;  %v1090_v54 = vld [vmem:[%s3032_s3] sm:$0xff] }
 0x1fb   :  { %2049 = vmatprep.subr.mxu1 %v1091_v48 }
 0x1fc   :  { %v956_v59 = vmul.f32 %v955_v57, %v949_v21  ;;  %v962_v63 = vrot.slane %v955_v57, 6  ;;  %v1113_v21 = vld [vmem:[%s3032_s3 + $0xb8] sm:$0xff]  ;;  %2050 = vmatpush3.msra.mxu1 %v1091_v48  ;;  %v1048_v57 = vsub.s32 0, %v2239_v11 }
 0x1fd   :  { %2051 = vmatprep.subr.mxu1 %v1090_v54 }
 0x1fe   :  { %v957_v33 = vsub.f32 %v733_v58, %v956_v59  ;;  %v970_v5 = vsel %vm969_vm0, %v968_v3, %v962_v63  ;;  %2052 = vmatpush3.msra.mxu1 %v1090_v54  ;;  %v1056_v58 = vsub.s32 1, %v2239_v11  ;;  %vm3097_vm0 = vcmp.lt.s32.totalorder %v2239_v11, 1 }
 0x1ff   :  { %2097 = vmatprep.subr.msk.mxu1 %vm2329_vm4, %v2184_v56 }
 0x200   :  { %v965_v1 = vrot.slane %v957_v33, 5 }
 0x202   :  { %v972_v6 = vsel %vm971_vm7, %v970_v5, %v965_v1  ;;  %vm3099_vm7 = vmmov %vm3097_vm0 }
 0x203   :  { %1981 = vmatmul.mubr.msk.f32.vlgmr.msra.gmra.mxu0 %vm3096_vm5, %v972_v6  ;;  %vm3098_vm5 = vmmov %vm3097_vm0 }
 0x204   :  { %1984 = vmatpush3.msra.mxu0 %v2623_v46  ;;  %v1116_v46 = vld [vmem:[%s3032_s3 + $0xd0] sm:$0xff] }
 0x205   :  { %1985 = vmatprep.subr.mxu0 %v1120_v8 }
 0x206   :  { %1986 = vmatpush3.msra.mxu0 %v1120_v8 }
 0x207   :  { %1987 = vmatprep.subr.mxu0 %v1119_v9 }
 0x208   :  { %1988 = vmatpush3.msra.mxu0 %v1119_v9 }
 0x209   :  { %1989 = vmatprep.subr.mxu0 %v1118_v10 }
 0x20a   :  { %1990 = vmatpush3.msra.mxu0 %v1118_v10 }
 0x20b   :  { %1991 = vmatprep.subr.mxu0 %v1117_v13 }
 0x20c   :  { %1992 = vmatpush3.msra.mxu0 %v1117_v13 }
 0x20d   :  { %1993 = vmatprep.subr.mxu0 %v1116_v46 }
 0x20e   :  { %1994 = vmatpush3.msra.mxu0 %v1116_v46 }
 0x20f   :  { %1995 = vmatprep.subr.mxu0 %v1115_v14 }
 0x210   :  { %1996 = vmatpush3.msra.mxu0 %v1115_v14 }
 0x211   :  { %1997 = vmatprep.subr.mxu0 %v1114_v19 }
 0x212   :  { %1998 = vmatpush3.msra.mxu0 %v1114_v19 }
 0x213   :  { %1999 = vmatprep.subr.mxu0 %v1113_v21 }
 0x214   :  { %2000 = vmatpush3.msra.mxu0 %v1113_v21 }
 0x215   :  { %2001 = vmatprep.subr.mxu0 %v1112_v23 }
 0x216   :  { %2002 = vmatpush3.msra.mxu0 %v1112_v23 }
 0x217   :  { %2003 = vmatprep.subr.mxu0 %v1111_v25 }
 0x218   :  { %2004 = vmatpush3.msra.mxu0 %v1111_v25 }
 0x219   :  { %2005 = vmatprep.subr.mxu0 %v1110_v28 }
 0x21a   :  { %2006 = vmatpush3.msra.mxu0 %v1110_v28 }
 0x21b   :  { %2007 = vmatprep.subr.mxu0 %v1109_v30 }
 0x21c   :  { %2008 = vmatpush3.msra.mxu0 %v1109_v30  ;;  %v1305_v30 = vld [vmem:[%s3032_s3 + $0x168] sm:$0xff] }
 0x21d   :  { %2009 = vmatprep.subr.mxu0 %v1108_v35 }
 0x21e   :  { %2010 = vmatpush3.msra.mxu0 %v1108_v35 }
 0x21f   :  { %2011 = vmatprep.subr.mxu0 %v1107_v38 }
 0x220   :  { %2012 = vmatpush3.msra.mxu0 %v1107_v38 }
 0x221   :  { %2013 = vmatprep.subr.mxu0 %v1106_v42 }
 0x222   :  { %2014 = vmatpush3.msra.mxu0 %v1106_v42 }
 0x223   :  { %2059 = vmatprep.subr.mxu0 %v1307_v50 }
 0x2c3   :  { %v2758_v59 = vpop.f32.mrf.mxu0 }
 0x2c4   :  { %v1049_v61 = vrot.slane %v2758_v59, %v1048_v57  ;;  %v1057_v63 = vrot.slane %v2758_v59, %v1056_v58 }
 0x2c5   :  { %v1982_v33 = vpop.f32.mrf.mxu0 }
 0x2c6   :  { %v1053_v1 = vmul.f32 %v1049_v61, %v2585_v27  ;;  %v1050_v3 = vmul.f32 %v1049_v61, %v2577_v15  ;;  %v1051_v5 = vmul.f32 %v1049_v61, %v2579_v18  ;;  %v1052_v6 = vmul.f32 %v1049_v61, %v2583_v26  ;;  %v1306_v15 = vld [vmem:[%s3032_s3 + $0x170] sm:$0xff] }
 0x2c8   :  { %v1058_v8 = vadd.f32 %v1057_v63, %v1050_v3  ;;  %v1059_v9 = vadd.f32 %v1057_v63, %v1051_v5  ;;  %v1060_v10 = vadd.f32 %v1057_v63, %v1052_v6  ;;  %v1061_v13 = vadd.f32 %v1057_v63, %v1053_v1 }
 0x2ca   :  { %v2770_v46 = vmax.f32 %v1058_v8, 0.0  ;;  %v2772_v14 = vmax.f32 %v1059_v9, 0.0  ;;  %v2774_v19 = vmax.f32 %v1060_v10, 0.0  ;;  %v2776_v21 = vmax.f32 %v1061_v13, 0.0 }
 0x2cc   :  { %2015 = vmatprep.mubr.f32.mxu0 %v2770_v46  ;;  %v1066_v18 = vrot.slane %v2770_v46, 7  ;;  %v1069_v26 = vrot.slane %v2776_v21, 7  ;;  %v1067_v27 = vrot.slane %v2772_v14, 7  ;;  %v1068_v23 = vrot.slane %v2774_v19, 7 }
 0x2cd   :  { %2016 = vmatmul.mubr.f32.vlgmr.msra.gmra.mxu0 %v2772_v14  ;;  %v1078_v31 = vrot.slane %v2770_v46, 1  ;;  %v1079_v35 = vrot.slane %v2772_v14, 1  ;;  %v1080_v48 = vrot.slane %v2774_v19, 1 }
 0x2ce   :  { %2060 = vmatpush3.msra.mxu0 %v1307_v50  ;;  %2018 = vmatprep.mubr.f32.mxu0 %v2774_v19  ;;  %v1073_v25 = vsel %vm3097_vm0, %v1069_v26, %v1066_v18  ;;  %v1072_v28 = vsel %vm3098_vm5, %v1066_v18, %v1067_v27  ;;  %v1071_v38 = vsel %vm3099_vm7, %v1067_v27, %v1068_v23  ;;  %v1081_v50 = vrot.slane %v2776_v21, 1 }
 0x2cf   :  { %2061 = vmatprep.subr.mxu0 %v1306_v15  ;;  %2053 = vmatprep.mubr.msk.f32.mxu1 %vm2294_vm1, %v1073_v25  ;;  %vm3100_vm1 = vcmp.lt.s32.totalorder %v2239_v11, 7  ;;  %v1070_v42 = vsel %vm3097_vm0, %v1068_v23, %v1069_v26  ;;  %vm3112_vm5 = vnez %v3093_v53  ;;  %vm3113_vm7 = vmmov 0  }
 0x2d0   :  { %2062 = vmatpush3.msra.mxu0 %v1306_v15  ;;  %2054 = vmatmul.mubr.f32.vlgmr.msra.gmra.mxu1 %v1072_v28  ;;  %v1084_v34 = vsel %vm3100_vm1, %v1078_v31, %v1079_v35 }
 0x2d1   :  { %2063 = vmatprep.subr.mxu0 %v1305_v30  ;;  %2019 = vmatmul.mubr.f32.gmra.mxu0 %v2776_v21 }
 0x2d2   :  { %2056 = vmatprep.mubr.msk.f32.mxu1 %vm2313_vm3, %v1071_v38  ;;  %2064 = vmatpush3.msra.mxu0 %v1305_v30  ;;  %vm3101_vm3 = vnez %v3083_v47 }
 0x2d3   :  { %2065 = vmatprep.subr.mxu0 %v1304_v37  ;;  %2091 = vmatprep.mubr.f32.mxu0 %v1084_v34 }
 0x2d4   :  { %2066 = vmatpush3.msra.mxu0 %v1304_v37  ;;  %2057 = vmatmul.mubr.f32.gmra.mxu1 %v1070_v42 }
 0x2d5   :  { %2067 = vmatprep.subr.mxu0 %v1303_v40  ;;  %2098 = vmatpush3.msk.msra.mxu1 %vm2329_vm4, %v2184_v56  ;;  %vm3102_vm4 = vnez %v3085_v49 }
 0x2d6   :  { %2068 = vmatpush3.msra.mxu0 %v1303_v40  ;;  %2099 = vmatprep.subr.msk.mxu1 %vm2361_vm6, %v2184_v56 }
 0x2d7   :  { %2069 = vmatprep.subr.mxu0 %v1302_v43  ;;  %2100 = vmatpush3.msk.msra.mxu1 %vm2361_vm6, %v2184_v56  ;;  %vm3103_vm6 = vmmov %vm3100_vm1 }
 0x2d8   :  { %2070 = vmatpush3.msra.mxu0 %v1302_v43  ;;  %2101 = vmatprep.subr.msk.mxu1 %vm2386_vm8, %v2184_v56  ;;  %v1083_v44 = vsel %vm3103_vm6, %v1079_v35, %v1080_v48 }
 0x2d9   :  { %2071 = vmatprep.subr.mxu0 %v1301_v41  ;;  %2102 = vmatpush3.msk.msra.mxu1 %vm2386_vm8, %v2184_v56  ;;  %vm3104_vm8 = vnez %v3087_v52 }
 0x2da   :  { %2072 = vmatpush3.msra.mxu0 %v1301_v41  ;;  %2103 = vmatprep.subr.msk.mxu1 %vm2396_vm9, %v2184_v56 }
 0x2db   :  { %2073 = vmatprep.subr.mxu0 %v1300_v51  ;;  %2104 = vmatpush3.msk.msra.mxu1 %vm2396_vm9, %v2184_v56  ;;  %vm3105_vm9 = vnez %v3063_v12 }
 0x2dc   :  { %2074 = vmatpush3.msra.mxu0 %v1300_v51  ;;  %2105 = vmatprep.subr.msk.mxu1 %vm2415_vm11, %v2184_v56 }
 0x2dd   :  { %2075 = vmatprep.subr.mxu0 %v1299_v4  ;;  %2106 = vmatpush3.msk.msra.mxu1 %vm2415_vm11, %v2184_v56  ;;  %vm3106_vm11 = vmmov %vm3100_vm1 }
 0x2de   :  { %2076 = vmatpush3.msra.mxu0 %v1299_v4  ;;  %2107 = vmatprep.subr.msk.mxu1 %vm2440_vm12, %v2184_v56  ;;  %v1082_v47 = vsel %vm3106_vm11, %v1080_v48, %v1081_v50 }
 0x2df   :  { %2077 = vmatprep.subr.mxu0 %v1298_v16  ;;  %2108 = vmatpush3.msk.msra.mxu1 %vm2440_vm12, %v2184_v56  ;;  %vm3107_vm12 = vnez %v3089_v55 }
 0x2e0   :  { %2078 = vmatpush3.msra.mxu0 %v1298_v16  ;;  %2109 = vmatprep.subr.msk.mxu1 %vm2452_vm13, %v2184_v56 }
 0x2e1   :  { %2079 = vmatprep.subr.mxu0 %v1297_v20  ;;  %2110 = vmatpush3.msk.msra.mxu1 %vm2452_vm13, %v2184_v56  ;;  %vm3108_vm13 = vmmov %vm3100_vm1  ;;  %vm3114_vm1 = vcmask 64512  }
 0x2e2   :  { %2080 = vmatpush3.msra.mxu0 %v1297_v20  ;;  %2111 = vmatprep.subr.msk.mxu1 %vm2464_vm14, %v2184_v56  ;;  %v1085_v12 = vsel %vm3108_vm13, %v1081_v50, %v1078_v31  ;;  %vm3115_vm0 = vmmov %vm3114_vm1 }
 0x2e3   :  { %2081 = vmatprep.subr.mxu0 %v1296_v24  ;;  %2112 = vmatpush3.msk.msra.mxu1 %vm2464_vm14, %v2184_v56  ;;  %vm3109_vm14 = vnez %v3091_v17  ;;  %vm3118_vm6 = vmmov %vm3115_vm0 }
 0x2e4   :  { %2082 = vmatpush3.msra.mxu0 %v1296_v24  ;;  %2113 = vmatprep.subr.msk.mxu1 %vm2476_vm15, %v2184_v56  ;;  %vm3121_vm11 = vmmov %vm3115_vm0 }
 0x2e5   :  { %2083 = vmatprep.subr.mxu0 %v1295_v29  ;;  %2114 = vmatpush3.msk.msra.mxu1 %vm2476_vm15, %v2184_v56  ;;  %vm3110_vm15 = vnez %v3095_v45 }
 0x2e6   :  { %2084 = vmatpush3.msra.mxu0 %v1295_v29  ;;  %2115 = vmatprep.subr.msk.mxu1 %vm2488_vm2, %v2184_v56 }
 0x2e7   :  { %2085 = vmatprep.subr.mxu0 %v1294_v32  ;;  %2116 = vmatpush3.msk.msra.mxu1 %vm2488_vm2, %v2184_v56  ;;  %vm3111_vm2 = vnez %v3069_v22 }
 0x2e8   :  { %2086 = vmatpush3.msra.mxu0 %v1294_v32  ;;  %2117 = vmatprep.subr.msk.mxu1 %vm3101_vm3, %v2184_v56 }
 0x2e9   :  { %2087 = vmatprep.subr.mxu0 %v1293_v36  ;;  %2118 = vmatpush3.msk.msra.mxu1 %vm3101_vm3, %v2184_v56  ;;  %vm3116_vm3 = vmmov %vm3115_vm0 }
 0x2ea   :  { %2088 = vmatpush3.msra.mxu0 %v1293_v36  ;;  %2119 = vmatprep.subr.msk.mxu1 %vm3102_vm4, %v2184_v56 }
 0x2eb   :  { %2089 = vmatprep.subr.mxu0 %v1292_v39  ;;  %2120 = vmatpush3.msk.msra.mxu1 %vm3102_vm4, %v2184_v56  ;;  %vm3117_vm4 = vmmov %vm3115_vm0 }
 0x2ec   :  { %2090 = vmatpush3.msra.mxu0 %v1292_v39  ;;  %2121 = vmatprep.subr.msk.mxu1 %vm3104_vm8, %v2184_v56 }
 0x2ed   :  { %2092 = vmatmul.mubr.msk.f32.vlgmr.msra.gmra.mxu0 %vm3105_vm9, %v1083_v44  ;;  %2122 = vmatpush3.msk.msra.mxu1 %vm3104_vm8, %v2184_v56  ;;  %vm3119_vm8 = vmmov %vm3115_vm0 }
 0x2ee   :  { %2094 = vmatprep.mubr.f32.mxu0 %v1082_v47  ;;  %2123 = vmatprep.subr.msk.mxu1 %vm3107_vm12, %v2184_v56  ;;  %vm3120_vm9 = vmmov %vm3115_vm0 }
 0x2ef   :  { %2124 = vmatpush3.msk.msra.mxu1 %vm3107_vm12, %v2184_v56  ;;  %2141 = vmatprep.subr.mxu0 %v2183_v0  ;;  %vm3122_vm12 = vmmov %vm3115_vm0 }
 0x2f0   :  { %2125 = vmatprep.subr.msk.mxu1 %vm3109_vm14, %v2184_v56  ;;  %2142 = vmatpush3.msk.msra.mxu0 %vm3110_vm15, %v2184_v56 }
 0x2f1   :  { %2095 = vmatmul.mubr.msk.f32.gmra.mxu0 %vm3111_vm2, %v1085_v12  ;;  %2126 = vmatpush3.msk.msra.mxu1 %vm3109_vm14, %v2184_v56 }
 0x2f2   :  { %2127 = vmatprep.subr.msk.mxu1 %vm3112_vm5, %v2184_v56  ;;  %2143 = vmatprep.mubr.msk.f32.mxu0 %vm3113_vm7, %v2183_v0 }
 0x2f3   :  { %2128 = vmatpush3.msk.msra.mxu1 %vm3112_vm5, %v2184_v56 }
 0x38d   :  { %v2017_v49 = vpop.f32.mrf.mxu0 }
 0x38f   :  { %v1188_v52 = vpop.f32.mrf.mxu0 }
 0x390   :  { %v2055_v55 = vpop.f32.mrf.mxu1 }
 0x391   :  { %v2020_v22 = vpop.f32.mrf.mxu0  ;;  %v1279_v33 = vadd.f32 %v2055_v55, %v2017_v49 }
 0x392   :  { %v1273_v45 = vpop.f32.mrf.mxu1 }
 0x393   :  { %v1198_v54 = vpop.f32.mrf.mxu0  ;;  %v1274_v63 = vadd.f32 %v1273_v45, %v1188_v52 }
 0x394   :  { %v2058_v61 = vpop.f32.mrf.mxu1 }
 0x395   :  { %v1289_v56 = vadd.f32 %v2058_v61, %v2020_v22 }
 0x396   :  { %v1283_v1 = vpop.f32.mrf.mxu1 }
 0x397   :  { %v1284_v8 = vadd.f32 %v1283_v1, %v1198_v54  ;;  %v1398_v1 = vld [vmem:[%s3033_s4 + $0x3] sm:$0x1] }
 0x3ad   :  { %v2093_v17 = vpop.f32.mrf.mxu0 }
 0x3ae   :  { %v2968_v6 = vadd.f32 %v2093_v17, %v1279_v33  ;;  %v1397_v17 = vld [vmem:[%s3033_s4 + $0x2] sm:$0x1] }
 0x3af   :  { %v1374_v3 = vpop.f32.mrf.mxu0 }
 0x3b0   :  { %v2966_v5 = vadd.f32 %v1374_v3, %v1274_v63  ;;  %v1400_v46 = vmul.f32 %v2968_v6, %v2968_v6 }
 0x3b1   :  { %v2096_v0 = vpop.f32.mrf.mxu0 }
 0x3b2   :  { %2129 = vmatprep.mubr.f32.mxu1 %v2966_v5  ;;  %v2974_v10 = vadd.f32 %v2096_v0, %v1289_v56  ;;  %v1399_v13 = vmul.f32 %v2966_v5, %v2966_v5 }
 0x3b3   :  { %v1384_v53 = vpop.f32.mrf.mxu0  ;;  %2130 = vmatmul.mubr.f32.vlgmr.msra.gmra.mxu1 %v2968_v6 }
 0x3b4   :  { %v2972_v9 = vadd.f32 %v1384_v53, %v1284_v8  ;;  %v1402_v19 = vmul.f32 %v2974_v10, %v2974_v10  ;;  %v1630_v53 = vsub.s32 2, %v2239_v11 }
 0x3b6   :  { %2132 = vmatprep.mubr.f32.mxu1 %v2972_v9  ;;  %v1401_v14 = vmul.f32 %v2972_v9, %v2972_v9 }
 0x3b7   :  { %2133 = vmatmul.mubr.f32.gmra.mxu1 %v2974_v10 }
 0x3b8   :  { %2135 = vmatprep.mubr.f32.mxu1 %v1399_v13  ;;  %v1631_v13 = vrot.slane %v2758_v59, %v1630_v53 }
 0x3bb   :  { %2136 = vmatmul.mubr.f32.gmra.mxu1 %v1400_v46  ;;  %v1641_v46 = vrot.slane %v2758_v59, 2 }
 0x3bc   :  { %2138 = vmatprep.mubr.f32.mxu1 %v1401_v14 }
 0x3bf   :  { %2139 = vmatmul.mubr.f32.gmra.mxu1 %v1402_v19 }
 0x473   :  { %v2131_v21 = vpop.f32.mrf.mxu1 }
 0x474   :  { %v1509_v27 = vsel %vm3115_vm0, %v2131_v21, 0.0 }
 0x475   :  { %v1469_v15 = vpop.f32.mrf.mxu1 }
 0x476   :  { %v1508_v18 = vsel %vm3114_vm1, %v1469_v15, 0.0  ;;  %v1632_v15 = vmul.f32 %v1631_v13, %v2569_v60 }
 0x477   :  { %v2134_v26 = vpop.f32.mrf.mxu1  ;;  %v1510_v23 = vadd.f32 %v1509_v27, %v1508_v18  ;;  %v1633_v18 = vmul.f32 %v1631_v13, %v2571_v62  ;;  %v1635_v27 = vmul.f32 %v1631_v13, %v2575_v7 }
 0x478   :  { %v1513_v35 = vsel %vm3117_vm4, %v2134_v26, 0.0  ;;  %v1634_v26 = vmul.f32 %v1631_v13, %v2573_v2 }
 0x479   :  { %v1479_v25 = vpop.f32.mrf.mxu1 }
 0x47a   :  { %v1511_v28 = vsel %vm3116_vm3, %v1479_v25, 0.0 }
 0x47b   :  { %v1512_v30 = vadd.f32 %v1511_v28, %v1510_v23  ;;  %v2137_v31 = vpop.f32.mrf.mxu1 }
 0x47c   :  { %v1522_v43 = vsel %vm3119_vm8, %v2137_v31, 0.0 }
 0x47d   :  { %v1514_v37 = vadd.f32 %v1513_v35, %v1512_v30  ;;  %v1489_v38 = vpop.f32.mrf.mxu1 }
 0x47e   :  { %v1521_v34 = vsel %vm3118_vm6, %v1489_v38, 0.0 }
 0x47f   :  { %v1515_v40 = vrot.slane %v1514_v37, 4  ;;  %v2140_v42 = vpop.f32.mrf.mxu1  ;;  %v1523_v51 = vadd.f32 %v1522_v43, %v1521_v34 }
 0x480   :  { %v1526_v29 = vsel %vm3121_vm11, %v2140_v42, 0.0 }
 0x481   :  { %v1516_v41 = vadd.f32 %v1515_v40, %v1514_v37  ;;  %v1499_v4 = vpop.f32.mrf.mxu1 }
 0x482   :  { %v1524_v16 = vsel %vm3120_vm9, %v1499_v4, 0.0 }
 0x483   :  { %v1517_v20 = vrot.slane %v1516_v41, 2  ;;  %v1525_v24 = vadd.f32 %v1524_v16, %v1523_v51 }
 0x485   :  { %v1518_v32 = vadd.f32 %v1517_v20, %v1516_v41  ;;  %v1527_v36 = vadd.f32 %v1526_v29, %v1525_v24 }
 0x487   :  { %v1519_v48 = vrot.slane %v1518_v32, 1  ;;  %v1528_v39 = vrot.slane %v1527_v36, 4 }
 0x489   :  { %v1529_v50 = vadd.f32 %v1528_v39, %v1527_v36  ;;  %v1520_v44 = vadd.f32 %v1519_v48, %v1518_v32 }
 0x48b   :  { %v1530_v47 = vrot.slane %v1529_v50, 2  ;;  %v1534_v49 = vmul.f32 0.001953125, %v1520_v44 }
 0x48d   :  { %v1531_v12 = vadd.f32 %v1530_v47, %v1529_v50  ;;  %v1536_v22 = vmul.f32 %v1534_v49, %v1534_v49 }
 0x48f   :  { %v1532_v52 = vrot.slane %v1531_v12, 1 }
 0x491   :  { %v1533_v55 = vadd.f32 %v1532_v52, %v1531_v12 }
 0x493   :  { %v1535_v45 = vmul.f32 0.001953125, %v1533_v55 }
 0x495   :  { %v1537_v54 = vsub.f32 %v1535_v45, %v1536_v22 }
 0x497   :  { %v1538_v61 = vadd.f32 1e-05, %v1537_v54 }
 0x499   :  { %2156 = vrsqrt.f32 %v1538_v61 }
 0x4a6   :  { %v2157_v63 = vpop.eup %2156 }
 0x4a7   :  { %v1540_v33 = vmul.f32 %v2157_v63, %v1397_v17 }
 0x4a9   :  { %v1541_v3 = vmul.f32 %v1540_v33, %v1534_v49 }
 0x4ab   :  { %v1542_v0 = vsub.f32 %v1398_v1, %v1541_v3 }
 0x4ad   :  { %v1544_v8 = vrot.slane %v1542_v0, 7 }
 0x4af   :  { %v1546_v56 = vsel %vm967_vm10, %v1540_v33, %v1544_v8 }
 0x4b0   :  { %2144 = vmatmul.mubr.msk.f32.vlgmr.msra.gmra.mxu0 %vm3122_vm12, %v1546_v56 }
 0x570   :  { %v1616_v14 = vpop.f32.mrf.mxu0 }
 0x571   :  { %v1623_v19 = vrot.slane %v1616_v14, %v1048_v57  ;;  %v1643_v21 = vadd.f32 %v1641_v46, %v1616_v14 }
 0x572   :  { %v2145_v23 = vpop.f32.mrf.mxu0 }
 0x573   :  { %v1624_v25 = vmul.f32 %v1623_v19, %v2966_v5  ;;  %v1625_v28 = vmul.f32 %v1623_v19, %v2968_v6  ;;  %v1626_v59 = vmul.f32 %v1623_v19, %v2972_v9  ;;  %v1627_v30 = vmul.f32 %v1623_v19, %v2974_v10 }
 0x574   :  { %v1647_v57 = vrot.slane %v1643_v21, %v1056_v58 }
 0x575   :  { %v1636_v31 = vadd.f32 %v1632_v15, %v1624_v25  ;;  %v1637_v60 = vadd.f32 %v1633_v18, %v1625_v28  ;;  %v1638_v35 = vadd.f32 %v1634_v26, %v1626_v59  ;;  %v1639_v62 = vadd.f32 %v1635_v27, %v1627_v30 }
 0x577   :  { %v1648_v37 = vadd.f32 %v1647_v57, %v1636_v31  ;;  %v1649_v2 = vadd.f32 %v1647_v57, %v1637_v60  ;;  %v1650_v38 = vadd.f32 %v1647_v57, %v1638_v35  ;;  %v1651_v7 = vadd.f32 %v1647_v57, %v1639_v62 }
 0x579   :  { %v1652_v34 = vmax.f32 %v1648_v37, 0.0  ;;  %v1653_v40 = vmax.f32 %v1649_v2, 0.0  ;;  %v1654_v5 = vmax.f32 %v1650_v38, 0.0  ;;  %v1655_v42 = vmax.f32 %v1651_v7, 0.0 }
 0x57b   :  { %1656 = vst [vmem:[%s3034_s5] sm:$0xff] %v1652_v34  ;;  %1657 = vst [vmem:[%s3034_s5 + $0x8] sm:$0xff] %v1653_v40 }
 0x57c   :  { %1658 = vst [vmem:[%s3034_s5 + $0x10] sm:$0xff] %v1654_v5  ;;  %1659 = vst [vmem:[%s3034_s5 + $0x18] sm:$0xff] %v1655_v42 }
 0x57d   :  { %1664 = vsyncpa [#allocation3], 1 }

</bundles_post_ra>
